<compile_context>
chip_gen: v6e
topology: v6e:2x2x1
jax: 0.10.0
libtpu: 0.0.40
codegen_flags: <defaults>
</compile_context>

<pallas_src>
import functools

import jax
import jax.numpy as jnp
import numpy as np
from jax import lax
from jax.experimental import pallas as pl
from jax.experimental.pallas import tpu as pltpu

GROUP_STRIDE = 5
GROUP_SIZE = 10
NUM_GROUPS = len(range(0, 90 + 1, GROUP_STRIDE))      # 19 overlapping windows
TOPK = (NUM_GROUPS - 1) * GROUP_STRIDE + GROUP_SIZE   # 100 columns needed

NEG_BIG = -1e30        # finite "minus infinity": exp() underflows to 0, no 0*inf NaNs
LANES = 128
SUBLANES = 8


def _round_up(x, m):
    return (x + m - 1) // m * m


def _pskd_v9_kernel(out_ref, tgt_ref, sub_o_ref, sub_t_ref, loss_ref,
                    m_acc, l_acc, dot_acc, tsum_acc, *, alpha, B, C, TB, TC):
    bi = pl.program_id(0)          # batch block (parallel)
    ci = pl.program_id(1)          # class chunk (arbitrary / reduction)

    # ---------------- streaming main term: running logsumexp over C ----------
    @pl.when(ci == 0)
    def _init():
        m_acc[...] = jnp.full_like(m_acc, NEG_BIG)
        l_acc[...] = jnp.zeros_like(l_acc)
        dot_acc[...] = jnp.zeros_like(dot_acc)
        tsum_acc[...] = jnp.zeros_like(tsum_acc)

    o = out_ref[...].astype(jnp.float32)        # (TB, TC)
    t = tgt_ref[...].astype(jnp.float32)        # (TB, TC)

    # mask ragged batch tail (rows >= B) and ragged class tail (cols >= C);
    # out-of-bounds tile data is unspecified, so select benign values.
    row_ids = bi * TB + lax.broadcasted_iota(jnp.int32, (TB, 1), 0)
    col_ids = ci * TC + lax.broadcasted_iota(jnp.int32, (1, TC), 1)
    valid = (row_ids < B) & (col_ids < C)       # (TB, TC)

    o_exp = jnp.where(valid, o, NEG_BIG)        # for max / exp-sum path
    o_dot = jnp.where(valid, o, 0.0)            # for the tgt*out dot product
    t_m = jnp.where(valid, t, 0.0)

    m_old = m_acc[...]
    m_new = jnp.maximum(m_old, jnp.max(o_exp, axis=1, keepdims=True))
    l_acc[...] = (l_acc[...] * jnp.exp(m_old - m_new)
                  + jnp.sum(jnp.exp(o_exp - m_new), axis=1, keepdims=True))
    m_acc[...] = m_new
    dot_acc[...] += jnp.sum(t_m * o_dot, axis=1, keepdims=True)
    tsum_acc[...] += jnp.sum(t_m, axis=1, keepdims=True)

    # --------- finalize + lane-dense windowed term on the last class chunk ---
    @pl.when(ci == pl.num_programs(1) - 1)
    def _finalize():
        # sum(-tgt * log_softmax(out)) == tsum * logsumexp(out) - sum(tgt * out)
        lse = m_acc[...] + jnp.log(l_acc[...])                    # (TB, 1)
        main = jnp.sum(tsum_acc[...] * lse - dot_acc[...])

        # windows: (GROUP_SIZE, NUM_GROUPS, TB) -> batch on the lane axis,
        # softmax / log_softmax reduce over the leading (cheap VPU) axis.
        so = sub_o_ref[...].astype(jnp.float32)
        st = sub_t_ref[...].astype(jnp.float32)

        lane_ids = bi * TB + lax.broadcasted_iota(jnp.int32, (1, 1, TB), 2)
        valid_lane = lane_ids < B                                 # (1,1,TB)

        st_e = jnp.exp(st - jnp.max(st, axis=0, keepdims=True))
        st_soft = st_e * pl.reciprocal(jnp.sum(st_e, axis=0, keepdims=True),
                                       approx=True)

        so_sh = so - jnp.max(so, axis=0, keepdims=True)
        so_logp = so_sh - jnp.log(jnp.sum(jnp.exp(so_sh), axis=0, keepdims=True))

        win = jnp.sum(jnp.where(valid_lane, -st_soft * so_logp, 0.0))

        # lane-dense per-batch-block partial sum; wrapper reads [bi, 0, 0].
        loss_ref[...] = jnp.full((1, SUBLANES, LANES),
                                 main + jnp.float32(alpha) * win,
                                 dtype=jnp.float32)


def pskd_v9_loss(output, targets, alpha):
    """Pallas implementation of Custom_CrossEntropy_PSKD_version9.forward."""
    B, C = output.shape
    assert targets.shape == output.shape
    assert C >= TOPK, "module requires at least 100 classes"
    itemsize = jnp.dtype(output.dtype).itemsize

    # ---- descending variadic sort (replaces argsort + two gathers) ----------
    # TODO(synk): the descending sort / index selection has no clean Pallas TPU
    # equivalent; it stays in XLA glue as a single fused variadic lax.sort.
    neg_t_sorted, out_sorted = jax.lax.sort((-targets, output), dimension=1,
                                            is_stable=True, num_keys=1)
    top_t = -neg_t_sorted[:, :TOPK]                               # (B, 100)
    top_o = out_sorted[:, :TOPK]                                  # (B, 100)
    win_idx = (np.arange(NUM_GROUPS) * GROUP_STRIDE)[:, None] + np.arange(GROUP_SIZE)[None, :]
    # lane-dense layout: (GROUP_SIZE, NUM_GROUPS, B); these are tiny (B x 190).
    sub_o = jnp.transpose(top_o[:, win_idx], (2, 1, 0))
    sub_t = jnp.transpose(top_t[:, win_idx], (2, 1, 0))

    # ---- per-generation VMEM budget ------------------------------------------
    try:
        vmem_cap = int(pltpu.get_tpu_info().vmem_capacity_bytes)
    except Exception:
        vmem_cap = 64 * 1024 * 1024
    if vmem_cap >= 96 * 1024 * 1024:          # v5e / v6e: 128 MiB physical VMEM
        budget = 48 * 1024 * 1024
        vmem_limit = 96 * 1024 * 1024
    else:                                      # v7x: 64 MiB physical VMEM
        budget = 26 * 1024 * 1024
        vmem_limit = 40 * 1024 * 1024

    # per-row VMEM cost for a class-tile width tc (honest accounting):
    #   2 inputs x 2 pipeline buffers x tc x itemsize   (pipelined logits/targets)
    # + ~5 x tc x 4                                     (f32 upcasts / where / exp temps)
    # + window tiles (double-buffered, sublane-padded)  + window f32 temps
    # + 4 lane-padded f32 accumulators
    def _row_bytes(tc):
        main = (2 * 2 * itemsize + 5 * 4) * tc
        win = (2 * 2 * GROUP_SIZE * _round_up(NUM_GROUPS, SUBLANES) * itemsize
               + 4 * GROUP_SIZE * NUM_GROUPS * 4)
        acc = 4 * LANES * 4
        return main + win + acc

    # widest class chunk that still allows >= 256 batch rows within budget
    tc_cap = max(LANES,
                 (((budget // 256 - _row_bytes(0)) // (2 * 2 * itemsize + 5 * 4))
                  // LANES) * LANES)
    if C <= tc_cap:
        TC, num_c_blocks = C, 1                # single chunk spans the full class axis
    else:
        TC = tc_cap                            # stream the class axis (128-multiple)
        num_c_blocks = -(-C // TC)

    tb_cap = int(budget // _row_bytes(TC))
    tb_cap = max(SUBLANES, min(512, tb_cap // SUBLANES * SUBLANES))

    B8 = _round_up(B, SUBLANES)
    if B8 <= tb_cap and B8 < 2 * LANES:
        TB = B8                                # single batch block (window lane dim == full)
    else:
        # batch sits on the lane axis of the window tiles, so multi-block TB
        # must be a multiple of 128; aim for >= 2 blocks (v7x dual TensorCore).
        tb128 = max(LANES, tb_cap // LANES * LANES)
        TB = min(tb128, _round_up(-(-B8 // 2), LANES))
    B_pad = _round_up(B, TB)
    num_b_blocks = B_pad // TB

    # pad only the tiny window tensors to B_pad (zeros; masked in-kernel).
    if B_pad > B:
        sub_o = jnp.pad(sub_o, ((0, 0), (0, 0), (0, B_pad - B)))
        sub_t = jnp.pad(sub_t, ((0, 0), (0, 0), (0, B_pad - B)))

    kernel = functools.partial(_pskd_v9_kernel, alpha=float(alpha),
                               B=B, C=C, TB=TB, TC=TC)
    cost = pl.CostEstimate(
        flops=int(8 * B * C + 40 * B * NUM_GROUPS * GROUP_SIZE),
        transcendentals=int(B * C + 2 * B + 3 * B * NUM_GROUPS * GROUP_SIZE),
        bytes_accessed=int(2 * B * C * itemsize
                           + 2 * GROUP_SIZE * NUM_GROUPS * B_pad * itemsize
                           + num_b_blocks * SUBLANES * LANES * 4),
    )

    partials = pl.pallas_call(
        kernel,
        out_shape=jax.ShapeDtypeStruct((num_b_blocks, SUBLANES, LANES), jnp.float32),
        grid=(num_b_blocks, num_c_blocks),
        in_specs=[
            pl.BlockSpec((TB, TC), lambda bi, ci: (bi, ci)),
            pl.BlockSpec((TB, TC), lambda bi, ci: (bi, ci)),
            pl.BlockSpec((GROUP_SIZE, NUM_GROUPS, TB), lambda bi, ci: (0, 0, bi)),
            pl.BlockSpec((GROUP_SIZE, NUM_GROUPS, TB), lambda bi, ci: (0, 0, bi)),
        ],
        out_specs=pl.BlockSpec((1, SUBLANES, LANES), lambda bi, ci: (bi, 0, 0)),
        scratch_shapes=[pltpu.VMEM((TB, 1), jnp.float32)] * 4,   # m, l, dot, tsum
        compiler_params=pltpu.CompilerParams(
            dimension_semantics=("parallel", "arbitrary"),
            vmem_limit_bytes=vmem_limit,
        ),
        cost_estimate=cost,
    )(output, targets, sub_o, sub_t)

    # per-batch-block partial sums (broadcast over their (8,128) tiles) -> total / B
    return jnp.sum(partials[:, 0, 0]) / B


def pskd_v9_loss_ref(output, targets, alpha):
    """Pure-JAX reference matching the PyTorch forward (step-5 windows)."""
    def pskd(o, t):
        lp = jax.nn.log_softmax(o, axis=1)
        return jnp.sum(jnp.mean(-t * lp, axis=0))

    loss = pskd(output, targets)
    idx = jnp.argsort(-targets, axis=1)
    for i in range(0, 90 + 1, 5):
        so = jnp.take_along_axis(output, idx[:, i:i + 10], axis=1)
        st = jax.nn.softmax(jnp.take_along_axis(targets, idx[:, i:i + 10], axis=1), axis=1)
        loss = loss + pskd(so, st) * alpha
    return loss


if __name__ == "__main__":
    key = jax.random.PRNGKey(0)
    k1, k2, k3 = jax.random.split(key, 3)

    B, C = 8, 128          # needs C >= 100 for the 19 top-k windows
    alpha = 0.5

    # logits from the "current" model
    output = jax.random.normal(k1, (B, C), dtype=jnp.float32)
    # targets: PSKD-style mix of previous-epoch softmax and hard one-hot labels
    prev_logits = jax.random.normal(k2, (B, C), dtype=jnp.float32)
    soft = jax.nn.softmax(prev_logits, axis=1)
    labels = jax.random.randint(k3, (B,), 0, C)
    hard = jax.nn.one_hot(labels, C, dtype=jnp.float32)
    targets = 0.7 * hard + 0.3 * soft

    loss = pskd_v9_loss(output, targets, alpha)
    loss = jax.block_until_ready(loss)

    ref = pskd_v9_loss_ref(output, targets, alpha)
    # rtol slightly relaxed (2e-3) because the window softmax uses the EUP
    # approximate reciprocal per the perf review.
    assert np.allclose(np.asarray(loss), np.asarray(ref), rtol=2e-3, atol=1e-3), (
        float(loss), float(ref))

    print("KERNEL_OK")
</pallas_src>

<mosaic_0001>
module attributes {stable_mosaic.version = 11 : i64} {
  func.func @_pskd_v9_kernel(%arg0: i32, %arg1: i32, %arg2: memref<8x128xf32, #tpu.memory_space<vmem>>, %arg3: memref<8x128xf32, #tpu.memory_space<vmem>>, %arg4: memref<10x19x8xf32, #tpu.memory_space<vmem>>, %arg5: memref<10x19x8xf32, #tpu.memory_space<vmem>>, %arg6: memref<1x8x128xf32, #tpu.memory_space<vmem>>, %arg7: memref<8x1xf32, #tpu.memory_space<vmem>>, %arg8: memref<8x1xf32, #tpu.memory_space<vmem>>, %arg9: memref<8x1xf32, #tpu.memory_space<vmem>>, %arg10: memref<8x1xf32, #tpu.memory_space<vmem>>) attributes {dimension_semantics = [#tpu.dimension_semantics<parallel>, #tpu.dimension_semantics<arbitrary>], iteration_bounds = array<i64: 1, 1>, scalar_prefetch = 0 : i64, scratch_operands = 4 : i64, tpu.core_type = #tpu.core_type<tc>, window_params = [{transform_indices = @transform_0, window_bounds = array<i64: 8, 128>}, {transform_indices = @transform_1, window_bounds = array<i64: 8, 128>}, {transform_indices = @transform_2, window_bounds = array<i64: 10, 19, 8>}, {transform_indices = @transform_3, window_bounds = array<i64: 10, 19, 8>}, {transform_indices = @transform_4, window_bounds = array<i64: 1, 8, 128>}]} {
    %c0_i32 = arith.constant 0 : i32
    %0 = arith.cmpi eq, %arg1, %c0_i32 : i32
    %1 = arith.extui %0 : i1 to i32
    %c0_i32_0 = arith.constant 0 : i32
    %2 = arith.cmpi ne, %1, %c0_i32_0 : i32
    scf.if %2 {
      %cst_30 = arith.constant -1.000000e+30 : f32
      %56 = vector.broadcast %cst_30 : f32 to vector<8x1xf32>
      %c0_31 = arith.constant 0 : index
      %c0_32 = arith.constant 0 : index
      %57 = vector.load %arg7[%c0_31, %c0_32] : memref<8x1xf32, #tpu.memory_space<vmem>>, vector<8x1xf32>
      tpu.vector_store %arg7[%c0_31, %c0_32], %56 {strides = array<i32>} : memref<8x1xf32, #tpu.memory_space<vmem>>, vector<8x1xf32>,
      %cst_33 = arith.constant 0.000000e+00 : f32
      %58 = vector.broadcast %cst_33 : f32 to vector<8x1xf32>
      %c0_34 = arith.constant 0 : index
      %c0_35 = arith.constant 0 : index
      %59 = vector.load %arg8[%c0_34, %c0_35] : memref<8x1xf32, #tpu.memory_space<vmem>>, vector<8x1xf32>
      tpu.vector_store %arg8[%c0_34, %c0_35], %58 {strides = array<i32>} : memref<8x1xf32, #tpu.memory_space<vmem>>, vector<8x1xf32>,
      %cst_36 = arith.constant 0.000000e+00 : f32
      %60 = vector.broadcast %cst_36 : f32 to vector<8x1xf32>
      %c0_37 = arith.constant 0 : index
      %c0_38 = arith.constant 0 : index
      %61 = vector.load %arg9[%c0_37, %c0_38] : memref<8x1xf32, #tpu.memory_space<vmem>>, vector<8x1xf32>
      tpu.vector_store %arg9[%c0_37, %c0_38], %60 {strides = array<i32>} : memref<8x1xf32, #tpu.memory_space<vmem>>, vector<8x1xf32>,
      %cst_39 = arith.constant 0.000000e+00 : f32
      %62 = vector.broadcast %cst_39 : f32 to vector<8x1xf32>
      %c0_40 = arith.constant 0 : index
      %c0_41 = arith.constant 0 : index
      %63 = vector.load %arg10[%c0_40, %c0_41] : memref<8x1xf32, #tpu.memory_space<vmem>>, vector<8x1xf32>
      tpu.vector_store %arg10[%c0_40, %c0_41], %62 {strides = array<i32>} : memref<8x1xf32, #tpu.memory_space<vmem>>, vector<8x1xf32>,
    } else {
    }
    %c0 = arith.constant 0 : index
    %c0_1 = arith.constant 0 : index
    %3 = vector.load %arg2[%c0, %c0_1] : memref<8x128xf32, #tpu.memory_space<vmem>>, vector<8x128xf32>
    %c0_2 = arith.constant 0 : index
    %c0_3 = arith.constant 0 : index
    %4 = vector.load %arg3[%c0_2, %c0_3] : memref<8x128xf32, #tpu.memory_space<vmem>>, vector<8x128xf32>
    %c8_i32 = arith.constant 8 : i32
    %5 = arith.muli %arg0, %c8_i32 : i32
    %6 = tpu.iota {dimensions = array<i32: 0>} : vector<8x1xi32>
    %7 = vector.broadcast %5 : i32 to vector<8x1xi32>
    %8 = arith.addi %7, %6 : vector<8x1xi32>
    %c128_i32 = arith.constant 128 : i32
    %9 = arith.muli %arg1, %c128_i32 : i32
    %10 = tpu.iota {dimensions = array<i32: 1>} : vector<1x128xi32>
    %11 = vector.broadcast %9 : i32 to vector<1x128xi32>
    %12 = arith.addi %11, %10 : vector<1x128xi32>
    %c8_i32_4 = arith.constant 8 : i32
    %13 = vector.broadcast %c8_i32_4 : i32 to vector<8x1xi32>
    %14 = arith.cmpi slt, %8, %13 : vector<8x1xi32>
    %c128_i32_5 = arith.constant 128 : i32
    %15 = vector.broadcast %c128_i32_5 : i32 to vector<1x128xi32>
    %16 = arith.cmpi slt, %12, %15 : vector<1x128xi32>
    %17 = vector.broadcast %14 : vector<8x1xi1> to vector<8x128xi1>
    %18 = vector.broadcast %16 : vector<1x128xi1> to vector<8x128xi1>
    %19 = arith.andi %17, %18 : vector<8x128xi1>
    %cst = arith.constant -1.000000e+30 : f32
    %20 = vector.broadcast %cst : f32 to vector<8x128xf32>
    %21 = arith.select %19, %3, %20 : vector<8x128xi1>, vector<8x128xf32>
    %cst_6 = arith.constant 0.000000e+00 : f32
    %22 = vector.broadcast %cst_6 : f32 to vector<8x128xf32>
    %23 = arith.select %19, %3, %22 : vector<8x128xi1>, vector<8x128xf32>
    %cst_7 = arith.constant 0.000000e+00 : f32
    %24 = vector.broadcast %cst_7 : f32 to vector<8x128xf32>
    %25 = arith.select %19, %4, %24 : vector<8x128xi1>, vector<8x128xf32>
    %c0_8 = arith.constant 0 : index
    %c0_9 = arith.constant 0 : index
    %26 = vector.load %arg7[%c0_8, %c0_9] : memref<8x1xf32, #tpu.memory_space<vmem>>, vector<8x1xf32>
    %cst_10 = arith.constant dense<0xFF800000> : vector<8xf32>
    %27 = vector.multi_reduction <maximumf>, %21, %cst_10 [1] : vector<8x128xf32> to vector<8xf32>
    %28 = vector.shape_cast %27 : vector<8xf32> to vector<8x1xf32>
    %29 = arith.maximumf %26, %28 : vector<8x1xf32>
    %c0_11 = arith.constant 0 : index
    %c0_12 = arith.constant 0 : index
    %30 = vector.load %arg8[%c0_11, %c0_12] : memref<8x1xf32, #tpu.memory_space<vmem>>, vector<8x1xf32>
    %31 = arith.subf %26, %29 : vector<8x1xf32>
    %32 = math.exp %31 : vector<8x1xf32>
    %33 = arith.mulf %30, %32 : vector<8x1xf32>
    %34 = vector.broadcast %29 : vector<8x1xf32> to vector<8x128xf32>
    %35 = arith.subf %21, %34 : vector<8x128xf32>
    %36 = math.exp %35 : vector<8x128xf32>
    %cst_13 = arith.constant dense<0.000000e+00> : vector<8xf32>
    %37 = vector.multi_reduction <add>, %36, %cst_13 [1] : vector<8x128xf32> to vector<8xf32>
    %38 = vector.shape_cast %37 : vector<8xf32> to vector<8x1xf32>
    %39 = arith.addf %33, %38 : vector<8x1xf32>
    %c0_14 = arith.constant 0 : index
    %c0_15 = arith.constant 0 : index
    %40 = vector.load %arg8[%c0_14, %c0_15] : memref<8x1xf32, #tpu.memory_space<vmem>>, vector<8x1xf32>
    tpu.vector_store %arg8[%c0_14, %c0_15], %39 {strides = array<i32>} : memref<8x1xf32, #tpu.memory_space<vmem>>, vector<8x1xf32>,
    %c0_16 = arith.constant 0 : index
    %c0_17 = arith.constant 0 : index
    %41 = vector.load %arg7[%c0_16, %c0_17] : memref<8x1xf32, #tpu.memory_space<vmem>>, vector<8x1xf32>
    tpu.vector_store %arg7[%c0_16, %c0_17], %29 {strides = array<i32>} : memref<8x1xf32, #tpu.memory_space<vmem>>, vector<8x1xf32>,
    %c0_18 = arith.constant 0 : index
    %c0_19 = arith.constant 0 : index
    %42 = vector.load %arg9[%c0_18, %c0_19] : memref<8x1xf32, #tpu.memory_space<vmem>>, vector<8x1xf32>
    %43 = arith.mulf %25, %23 : vector<8x128xf32>
    %cst_20 = arith.constant dense<0.000000e+00> : vector<8xf32>
    %44 = vector.multi_reduction <add>, %43, %cst_20 [1] : vector<8x128xf32> to vector<8xf32>
    %45 = vector.shape_cast %44 : vector<8xf32> to vector<8x1xf32>
    %46 = arith.addf %42, %45 : vector<8x1xf32>
    %c0_21 = arith.constant 0 : index
    %c0_22 = arith.constant 0 : index
    %47 = vector.load %arg9[%c0_21, %c0_22] : memref<8x1xf32, #tpu.memory_space<vmem>>, vector<8x1xf32>
    tpu.vector_store %arg9[%c0_21, %c0_22], %46 {strides = array<i32>} : memref<8x1xf32, #tpu.memory_space<vmem>>, vector<8x1xf32>,
    %c0_23 = arith.constant 0 : index
    %c0_24 = arith.constant 0 : index
    %48 = vector.load %arg10[%c0_23, %c0_24] : memref<8x1xf32, #tpu.memory_space<vmem>>, vector<8x1xf32>
    %cst_25 = arith.constant dense<0.000000e+00> : vector<8xf32>
    %49 = vector.multi_reduction <add>, %25, %cst_25 [1] : vector<8x128xf32> to vector<8xf32>
    %50 = vector.shape_cast %49 : vector<8xf32> to vector<8x1xf32>
    %51 = arith.addf %48, %50 : vector<8x1xf32>
    %c0_26 = arith.constant 0 : index
    %c0_27 = arith.constant 0 : index
    %52 = vector.load %arg10[%c0_26, %c0_27] : memref<8x1xf32, #tpu.memory_space<vmem>>, vector<8x1xf32>
    tpu.vector_store %arg10[%c0_26, %c0_27], %51 {strides = array<i32>} : memref<8x1xf32, #tpu.memory_space<vmem>>, vector<8x1xf32>,
    %c0_i32_28 = arith.constant 0 : i32
    %53 = arith.cmpi eq, %arg1, %c0_i32_28 : i32
    %54 = arith.extui %53 : i1 to i32
    %c0_i32_29 = arith.constant 0 : i32
    %55 = arith.cmpi ne, %54, %c0_i32_29 : i32
    scf.if %55 {
      %c0_30 = arith.constant 0 : index
      %c0_31 = arith.constant 0 : index
      %56 = vector.load %arg7[%c0_30, %c0_31] : memref<8x1xf32, #tpu.memory_space<vmem>>, vector<8x1xf32>
      %c0_32 = arith.constant 0 : index
      %c0_33 = arith.constant 0 : index
      %57 = vector.load %arg8[%c0_32, %c0_33] : memref<8x1xf32, #tpu.memory_space<vmem>>, vector<8x1xf32>
      %58 = math.log %57 : vector<8x1xf32>
      %59 = arith.addf %56, %58 : vector<8x1xf32>
      %c0_34 = arith.constant 0 : index
      %c0_35 = arith.constant 0 : index
      %60 = vector.load %arg10[%c0_34, %c0_35] : memref<8x1xf32, #tpu.memory_space<vmem>>, vector<8x1xf32>
      %61 = arith.mulf %60, %59 : vector<8x1xf32>
      %c0_36 = arith.constant 0 : index
      %c0_37 = arith.constant 0 : index
      %62 = vector.load %arg9[%c0_36, %c0_37] : memref<8x1xf32, #tpu.memory_space<vmem>>, vector<8x1xf32>
      %63 = arith.subf %61, %62 : vector<8x1xf32>
      %64 = vector.shape_cast %63 : vector<8x1xf32> to vector<1x8x1xf32>
      %cst_38 = arith.constant dense<0.000000e+00> : vector<1xf32>
      %65 = vector.multi_reduction <add>, %64, %cst_38 [1, 2] : vector<1x8x1xf32> to vector<1xf32>
      %66 = vector.shape_cast %65 : vector<1xf32> to vector<1x1x1xf32>
      %67 = vector.extract %66[0, 0, 0] : f32 from vector<1x1x1xf32>
      %c0_39 = arith.constant 0 : index
      %c0_40 = arith.constant 0 : index
      %c0_41 = arith.constant 0 : index
      %68 = vector.load %arg4[%c0_39, %c0_40, %c0_41] : memref<10x19x8xf32, #tpu.memory_space<vmem>>, vector<10x19x8xf32>
      %c0_42 = arith.constant 0 : index
      %c0_43 = arith.constant 0 : index
      %c0_44 = arith.constant 0 : index
      %69 = vector.load %arg5[%c0_42, %c0_43, %c0_44] : memref<10x19x8xf32, #tpu.memory_space<vmem>>, vector<10x19x8xf32>
      %c8_i32_45 = arith.constant 8 : i32
      %70 = arith.muli %arg0, %c8_i32_45 : i32
      %71 = tpu.iota {dimensions = array<i32: 2>} : vector<1x1x8xi32>
      %72 = vector.broadcast %70 : i32 to vector<1x1x8xi32>
      %73 = arith.addi %72, %71 : vector<1x1x8xi32>
      %c8_i32_46 = arith.constant 8 : i32
      %74 = vector.broadcast %c8_i32_46 : i32 to vector<1x1x8xi32>
      %75 = arith.cmpi slt, %73, %74 : vector<1x1x8xi32>
      %cst_47 = arith.constant dense<0xFF800000> : vector<19x8xf32>
      %76 = vector.multi_reduction <maximumf>, %69, %cst_47 [0] : vector<10x19x8xf32> to vector<19x8xf32>
      %77 = vector.shape_cast %76 : vector<19x8xf32> to vector<1x19x8xf32>
      %78 = vector.broadcast %77 : vector<1x19x8xf32> to vector<10x19x8xf32>
      %79 = arith.subf %69, %78 : vector<10x19x8xf32>
      %80 = math.exp %79 : vector<10x19x8xf32>
      %cst_48 = arith.constant dense<0.000000e+00> : vector<19x8xf32>
      %81 = vector.multi_reduction <add>, %80, %cst_48 [0] : vector<10x19x8xf32> to vector<19x8xf32>
      %82 = vector.shape_cast %81 : vector<19x8xf32> to vector<1x19x8xf32>
      %83 = tpu.reciprocal %82 {approx = true} : vector<1x19x8xf32> -> vector<1x19x8xf32>
      %84 = vector.broadcast %83 : vector<1x19x8xf32> to vector<10x19x8xf32>
      %85 = arith.mulf %80, %84 : vector<10x19x8xf32>
      %cst_49 = arith.constant dense<0xFF800000> : vector<19x8xf32>
      %86 = vector.multi_reduction <maximumf>, %68, %cst_49 [0] : vector<10x19x8xf32> to vector<19x8xf32>
      %87 = vector.shape_cast %86 : vector<19x8xf32> to vector<1x19x8xf32>
      %88 = vector.broadcast %87 : vector<1x19x8xf32> to vector<10x19x8xf32>
      %89 = arith.subf %68, %88 : vector<10x19x8xf32>
      %90 = math.exp %89 : vector<10x19x8xf32>
      %cst_50 = arith.constant dense<0.000000e+00> : vector<19x8xf32>
      %91 = vector.multi_reduction <add>, %90, %cst_50 [0] : vector<10x19x8xf32> to vector<19x8xf32>
      %92 = vector.shape_cast %91 : vector<19x8xf32> to vector<1x19x8xf32>
      %93 = math.log %92 : vector<1x19x8xf32>
      %94 = vector.broadcast %93 : vector<1x19x8xf32> to vector<10x19x8xf32>
      %95 = arith.subf %89, %94 : vector<10x19x8xf32>
      %cst_51 = arith.constant 0.000000e+00 : f32
      %96 = vector.broadcast %cst_51 : f32 to vector<10x19x8xf32>
      %97 = arith.subf %96, %85 : vector<10x19x8xf32>
      %98 = arith.mulf %97, %95 : vector<10x19x8xf32>
      %cst_52 = arith.constant 0.000000e+00 : f32
      %99 = vector.shape_cast %75 : vector<1x1x8xi1> to vector<1x1x8xi1>
      %100 = vector.broadcast %99 : vector<1x1x8xi1> to vector<10x19x8xi1>
      %101 = vector.broadcast %cst_52 : f32 to vector<10x19x8xf32>
      %102 = arith.select %100, %98, %101 : vector<10x19x8xi1>, vector<10x19x8xf32>
      %103 = vector.shape_cast %102 : vector<10x19x8xf32> to vector<1x10x19x8xf32>
      %cst_53 = arith.constant dense<0.000000e+00> : vector<1xf32>
      %104 = vector.multi_reduction <add>, %103, %cst_53 [1, 2, 3] : vector<1x10x19x8xf32> to vector<1xf32>
      %105 = vector.shape_cast %104 : vector<1xf32> to vector<1x1x1x1xf32>
      %106 = vector.extract %105[0, 0, 0, 0] : f32 from vector<1x1x1x1xf32>
      %cst_54 = arith.constant 5.000000e-01 : f32
      %107 = arith.mulf %cst_54, %106 : f32
      %108 = arith.addf %67, %107 : f32
      %109 = vector.broadcast %108 : f32 to vector<1x8x128xf32>
      %c0_55 = arith.constant 0 : index
      %c0_56 = arith.constant 0 : index
      %c0_57 = arith.constant 0 : index
      %110 = vector.load %arg6[%c0_55, %c0_56, %c0_57] : memref<1x8x128xf32, #tpu.memory_space<vmem>>, vector<1x8x128xf32>
      tpu.vector_store %arg6[%c0_55, %c0_56, %c0_57], %109 {strides = array<i32>} : memref<1x8x128xf32, #tpu.memory_space<vmem>>, vector<1x8x128xf32>,
    } else {
    }
    return
  }
  func.func @transform_0(%arg0: i32, %arg1: i32) -> (i32, i32) {
    %c0_i32 = arith.constant 0 : i32
    return %arg0, %arg1 : i32, i32
  }
  func.func @transform_1(%arg0: i32, %arg1: i32) -> (i32, i32) {
    %c0_i32 = arith.constant 0 : i32
    return %arg0, %arg1 : i32, i32
  }
  func.func @transform_2(%arg0: i32, %arg1: i32) -> (i32, i32, i32) {
    %c0_i32 = arith.constant 0 : i32
    %c0_i32_0 = arith.constant 0 : i32
    %c0_i32_1 = arith.constant 0 : i32
    return %c0_i32, %c0_i32_0, %arg0 : i32, i32, i32
  }
  func.func @transform_3(%arg0: i32, %arg1: i32) -> (i32, i32, i32) {
    %c0_i32 = arith.constant 0 : i32
    %c0_i32_0 = arith.constant 0 : i32
    %c0_i32_1 = arith.constant 0 : i32
    return %c0_i32, %c0_i32_0, %arg0 : i32, i32, i32
  }
  func.func @transform_4(%arg0: i32, %arg1: i32) -> (i32, i32, i32) {
    %c0_i32 = arith.constant 0 : i32
    %c0_i32_0 = arith.constant 0 : i32
    %c0_i32_1 = arith.constant 0 : i32
    return %arg0, %c0_i32, %c0_i32_0 : i32, i32, i32
  }
}

</mosaic_0001>

<bundles_post_ra>
// kernel: tpu_custom_call.1
= control target key start
LH: loop header
LB: loop body
LE: loop exit
PB: predicated region body
PF: predicated region fallthrough
CT: control target
= control target key end

     0   :  { %s2119_s0 = inlined_call_operand.vmem [shape: f32[8,128], index: 0, kind: input, shape index: {}]   ;;  %s2120_s1 = inlined_call_operand.vmem [shape: f32[8,128], index: 1, kind: input, shape index: {}]   ;;  %s2121_s2 = inlined_call_operand.vmem [shape: f32[10,19,8], index: 2, kind: input, shape index: {}]   ;;  %s2122_s3 = inlined_call_operand.vmem [shape: f32[10,19,8], index: 3, kind: input, shape index: {}]   ;;  %s2123_s4 = inlined_call_operand.hbm [shape: f32[1,8,128], index: 4, kind: output, shape index: {}]  }
   0x1   :  { %v1025_v0 = vld [vmem:[%s2119_s0] sm:$0xff] }
   0x2   :  { %9 = vsyncpa [#allocation7], 0  ;;  %50 = vmax.xlane.f32.xlu0 %v1025_v0  ;;  %vm22_vm0 = vcmask 7168   ;;  %v993_v1 = vmov -1e+30   ;;  %v994_v2 = vmov 0  }
   0x3   :  { %23 = vst.msk [vmem:[#allocation2] sm:$0xff] %vm22_vm0, %v993_v1  ;;  %832 = vset.pattern.permute.xlu0 %v994_v2  ;;  %v995_v3 = vmov 0.0   ;;  %vm167_vm1 = vcmask 64512   ;;  %v1045_v8 = vld [vmem:[%s2122_s3] sm:$0xff]  ;;  %v1050_v9 = vld [vmem:[%s2122_s3 + $0x8] sm:$0xff]  ;;  %v1055_v10 = vld [vmem:[%s2122_s3 + $0x18] sm:$0xff] }
   0x4   :  { %24 = vst.msk [vmem:[#allocation3] sm:$0xff] %vm22_vm0, %v995_v3  ;;  %25 = vst.msk [vmem:[#allocation4] sm:$0xff] %vm22_vm0, %v995_v3  ;;  %v1060_v11 = vld [vmem:[%s2122_s3 + $0x20] sm:$0xff]  ;;  %v168_v12 = vsel %vm167_vm1, %v1045_v8, -inf  ;;  %v187_v13 = vsel %vm167_vm1, %v1050_v9, -inf  ;;  %v1069_v14 = vld [vmem:[%s2122_s3 + $0x30] sm:$0xff] }
   0x5   :  { %26 = vst.msk [vmem:[#allocation5] sm:$0xff] %vm22_vm0, %v995_v3  ;;  %v1074_v15 = vld [vmem:[%s2122_s3 + $0x38] sm:$0xff]  ;;  %v169_v16 = vsel %vm167_vm1, %v1055_v10, -inf  ;;  %v188_v17 = vsel %vm167_vm1, %v1060_v11, -inf  ;;  %v1083_v18 = vld [vmem:[%s2122_s3 + $0x48] sm:$0xff]  ;;  %v1088_v19 = vld [vmem:[%s2122_s3 + $0x50] sm:$0xff] }
   0x6   :  { %v170_v20 = vsel %vm167_vm1, %v1069_v14, -inf  ;;  %v189_v21 = vsel %vm167_vm1, %v1074_v15, -inf  ;;  %vm206_vm2 = vcmask 59392   ;;  %v1097_v22 = vld [vmem:[%s2122_s3 + $0x60] sm:$0xff]  ;;  %v1102_v23 = vld [vmem:[%s2122_s3 + $0x68] sm:$0xff]  ;;  %v172_v25 = vsel %vm167_vm1, %v1083_v18, -inf }
   0x7   :  { %v171_v24 = vmax.f32 %v168_v12, %v170_v20  ;;  %v190_v26 = vmax.f32 %v187_v13, %v189_v21  ;;  %v191_v27 = vsel %vm167_vm1, %v1088_v19, -inf  ;;  %v1111_v28 = vld [vmem:[%s2122_s3 + $0x78] sm:$0xff]  ;;  %v1116_v29 = vld [vmem:[%s2122_s3 + $0x80] sm:$0xff]  ;;  %v173_v30 = vmax.f32 %v169_v16, %v172_v25  ;;  %v1125_v34 = vld [vmem:[%s2122_s3 + $0x10] sm:$0x7]  ;;  %s996_s29 = smov [#allocation6]  }
   0x8   :  { %v174_v31 = vsel %vm167_vm1, %v1097_v22, -inf  ;;  %v192_v32 = vmax.f32 %v188_v17, %v191_v27  ;;  %v193_v33 = vsel %vm167_vm1, %v1102_v23, -inf  ;;  %v1130_v35 = vld [vmem:[%s2122_s3 + $0x28] sm:$0x7]  ;;  %v1135_v36 = vld [vmem:[%s2122_s3 + $0x90] sm:$0xff]  ;;  %v1140_v37 = vld [vmem:[%s2122_s3 + $0x98] sm:$0xff] }
   0x9   :  { %v175_v38 = vmax.f32 %v171_v24, %v174_v31  ;;  %v176_v39 = vsel %vm167_vm1, %v1111_v28, -inf  ;;  %v194_v40 = vmax.f32 %v190_v26, %v193_v33  ;;  %v195_v41 = vsel %vm167_vm1, %v1116_v29, -inf  ;;  %v1149_v42 = vld [vmem:[%s2122_s3 + $0x40] sm:$0x7]  ;;  %v1154_v43 = vld [vmem:[%s2122_s3 + $0x58] sm:$0x7] }
   0xa   :  { %v1032_v4 = vld [vmem:[#allocation2] sm:$0xff]  ;;  %v1159_v44 = vld [vmem:[%s2122_s3 + $0xa8] sm:$0xff]  ;;  %v1164_v45 = vld [vmem:[%s2122_s3 + $0xb0] sm:$0xff]  ;;  %v177_v46 = vmax.f32 %v173_v30, %v176_v39  ;;  %v178_v47 = vsel %vm167_vm1, %v1135_v36, -inf  ;;  %v196_v48 = vmax.f32 %v192_v32, %v195_v41  ;;  %v197_v49 = vsel %vm167_vm1, %v1140_v37, -inf  ;;  %s816_s30 = sshll.u32 %s996_s29, 4  ;;  %s817_s30 = int_to_ptr.vmem [resolvable:$true] %s816_s30 }
   0xb   :  { %2156 = vst [vmem:[#allocation9_spill] sm:$0xff] %v1032_v4  ;;  %v1173_v50 = vld [vmem:[%s2122_s3 + $0x70] sm:$0x7]  ;;  %v1178_v51 = vld [vmem:[%s2122_s3 + $0xc0] sm:$0xff]  ;;  %v1183_v52 = vld [vmem:[%s2122_s3 + $0xc8] sm:$0xff]  ;;  %v179_v53 = vmax.f32 %v175_v38, %v178_v47  ;;  %v180_v54 = vsel %vm167_vm1, %v1159_v44, -inf  ;;  %v198_v55 = vmax.f32 %v194_v40, %v197_v49  ;;  %p976_p1 = scmp.lt.s32.totalorder %s817_s30, %s817_s30 }
   0xc   :  { %v199_v56 = vsel %vm167_vm1, %v1164_v45, -inf  ;;  %v1192_v57 = vld [vmem:[%s2122_s3 + $0x88] sm:$0x7]  ;;  %v1197_v58 = vld [vmem:[%s2122_s3 + $0xd8] sm:$0xff]  ;;  %v1202_v59 = vld [vmem:[%s2122_s3 + $0xe0] sm:$0xff]  ;;  %v181_v60 = vmax.f32 %v177_v46, %v180_v54  ;;  %v182_v61 = vsel %vm167_vm1, %v1178_v51, -inf }
   0xd   :  { %v200_v62 = vmax.f32 %v196_v48, %v199_v56  ;;  %v201_v63 = vsel %vm167_vm1, %v1183_v52, -inf  ;;  %v1211_v1 = vld [vmem:[%s2121_s2] sm:$0xff]  ;;  %v1216_v2 = vld [vmem:[%s2121_s2 + $0x18] sm:$0xff]  ;;  %v1221_v3 = vld [vmem:[%s2121_s2 + $0x30] sm:$0xff]  ;;  %v184_v12 = vsel %vm167_vm1, %v1197_v58, -inf  ;;  %v203_v16 = vsel %vm167_vm1, %v1202_v59, -inf }
   0xe   :  { %v202_v13 = vmax.f32 %v198_v55, %v201_v63  ;;  %v1230_v17 = vld [vmem:[%s2122_s3 + $0xa0] sm:$0x7]  ;;  %v1235_v20 = vld [vmem:[%s2122_s3 + $0xb8] sm:$0x7]  ;;  %v185_v21 = vmax.f32 %v181_v60, %v184_v12  ;;  %v207_v25 = vsel %vm206_vm2, %v1125_v34, -inf  ;;  %v208_v26 = vsel %vm206_vm2, %v1130_v35, -inf }
   0xf   :  { %v204_v24 = vmax.f32 %v200_v62, %v203_v16  ;;  %v1244_v27 = vld [vmem:[%s2121_s2 + $0x8] sm:$0xff]  ;;  %v209_v31 = vsel %vm206_vm2, %v1149_v42, -inf  ;;  %v211_v32 = vsel %vm206_vm2, %v1154_v43, -inf  ;;  %v213_v33 = vsel %vm206_vm2, %v1173_v50, -inf  ;;  %v1262_v39 = vld [vmem:[%s2122_s3 + $0xd0] sm:$0x7] }
  0x10   :  { %v1249_v30 = vld [vmem:[%s2121_s2 + $0x48] sm:$0xff]  ;;  %v215_v38 = vsel %vm206_vm2, %v1192_v57, -inf  ;;  %v210_v41 = vmax.f32 %v207_v25, %v209_v31  ;;  %v212_v46 = vmax.f32 %v208_v26, %v211_v32  ;;  %v406_v47 = vsel %vm167_vm1, %v1211_v1, -inf  ;;  %v1276_v49 = vld [vmem:[%s2121_s2 + $0x38] sm:$0xff]  ;;  %v1314_v26 = vld [vmem:[%s2121_s2 + $0x50] sm:$0xff]  ;;  %s971_s6 = scalar_lea.vmem %s817_s30, 128 }
  0x11   :  { %v1267_v40 = vld [vmem:[%s2122_s3 + $0xe8] sm:$0x7]  ;;  %v408_v48 = vsel %vm167_vm1, %v1221_v3, -inf  ;;  %v217_v55 = vsel %vm206_vm2, %v1230_v17, -inf  ;;  %v219_v56 = vsel %vm206_vm2, %v1235_v20, -inf  ;;  %v407_v60 = vsel %vm167_vm1, %v1216_v2, -inf  ;;  %p972_p0 = scmp.ne.s32.totalorder %s817_s30, %s971_s6  ;;  %p977_p2 = scmp.lt.s32.totalorder %s971_s6, %s971_s6 }
  0x12   :  { %v214_v62 = vmax.f32 %v210_v41, %v213_v33  ;;  %v216_v63 = vmax.f32 %v212_v46, %v215_v38  ;;  %v410_v12 = vsel %vm167_vm1, %v1249_v30, -inf  ;;  %v221_v16 = vsel %vm206_vm2, %v1262_v39, -inf  ;;  %v1323_v41 = vld [vmem:[%s2121_s2 + $0x68] sm:$0xff]  ;;  %v1328_v46 = vld [vmem:[%s2121_s2 + $0x90] sm:$0xff] }
  0x13   :  { %v409_v25 = vmax.f32 %v406_v47, %v408_v48  ;;  %v427_v38 = vsel %vm167_vm1, %v1276_v49, -inf  ;;  %v411_v48 = vmax.f32 %v407_v60, %v410_v12  ;;  %v1339_v7 = vld [vmem:[%s2121_s2 + $0xa8] sm:$0xff]  ;;  %v416_v12 = vsel %vm167_vm1, %v1328_v46, -inf  ;;  %p978_p3 = por %p977_p2, %p976_p1 }
  0x14   :  { %v218_v31 = vmax.f32 %v214_v62, %v217_v55  ;;  %v220_v32 = vmax.f32 %v216_v63, %v219_v56  ;;  %2159 = vst [vmem:[#allocation12_spill] sm:$0xff] %v1339_v7 }
  0x15   :  { %p979_p4 = pnand %p978_p3, %p972_p0 }
  0x16   :  { %v222_v55 = vmax.f32 %v218_v31, %v221_v16  ;;  %v431_v16 = vsel %vm167_vm1, %v1323_v41, -inf }
  0x8b   :  { %v51_v5 = vpop.xlane.xlu0 %50 }
  0x8c   :  { %v1035_v6 = vmax.f32 %v1032_v4, %v51_v5  ;;  %v183_v5 = vmax.f32 %v179_v53, %v182_v61  ;;  %v1281_v53 = vld [vmem:[%s2121_s2 + $0x60] sm:$0xff]  ;;  %v1291_v61 = vmax.f32 %v202_v13, %v204_v24  ;;  %v425_v13 = vsel %vm167_vm1, %v1244_v27, -inf }
  0x8d   :  { %2158 = vst [vmem:[#allocation11_spill] sm:$0xff] %v1281_v53  ;;  %v1309_v24 = vld [vmem:[%s2121_s2 + $0x20] sm:$0xff]  ;;  %v412_v33 = vsel %vm167_vm1, %v1281_v53, -inf  ;;  %v428_v53 = vmax.f32 %v425_v13, %v427_v38  ;;  %v418_v38 = vsel %vm167_vm1, %v1339_v7, -inf }
  0x8e   :  { %2157 = vst [vmem:[#allocation10_spill] sm:$0xff] %v1035_v6  ;;  %71 = vst.msk [vmem:[#allocation2] sm:$0xff] %vm22_vm0, %v1035_v6  ;;  %60 = vperm.xlu0 %832, %v1035_v6   ;;  %v1283_v54 = vmax.f32 %v183_v5, %v185_v21  ;;  %v1298_v5 = vld [vmem:[%s2121_s2 + $0x78] sm:$0xff]  ;;  %v223_v21 = vsel %vm206_vm2, %v1267_v40, -inf  ;;  %v227_v62 = vsub.f32 %v1050_v9, %v1291_v61  ;;  %v426_v4 = vsel %vm167_vm1, %v1309_v24, -inf }
  0x8f   :  { %v224_v56 = vmax.f32 %v220_v32, %v223_v21  ;;  %v414_v63 = vsel %vm167_vm1, %v1298_v5, -inf  ;;  %v413_v6 = vmax.f32 %v409_v25, %v412_v33  ;;  %v1356_v21 = vld [vmem:[%s2121_s2 + $0x80] sm:$0xff]  ;;  %v230_v25 = vsub.f32 %v1060_v11, %v1291_v61 }
  0x90   :  { %v226_v47 = vsub.f32 %v1045_v8, %v1283_v54  ;;  %v429_v8 = vsel %vm167_vm1, %v1314_v26, -inf  ;;  %v229_v9 = vsub.f32 %v1055_v10, %v1283_v54  ;;  %v415_v31 = vmax.f32 %v411_v48, %v414_v63  ;;  %v1374_v11 = vld [vmem:[%s2121_s2 + $0xc0] sm:$0xff] }
  0x91   :  { %v1345_v60 = vmax.f32 %v222_v55, %v224_v56  ;;  %v258_v33 = vmul.f32 1.442695, %v227_v62  ;;  %v1369_v55 = vld [vmem:[%s2121_s2 + $0x98] sm:$0xff]  ;;  %2161 = vst [vmem:[#allocation14_spill] sm:$0xff] %v1374_v11  ;;  %v430_v48 = vmax.f32 %v426_v4, %v429_v8  ;;  %v232_v56 = vsub.f32 %v1069_v14, %v1283_v54 }
  0x92   :  { %v256_v13 = vmul.f32 1.442695, %v226_v47  ;;  %2160 = vst [vmem:[#allocation13_spill] sm:$0xff] %v1369_v55  ;;  %v417_v47 = vmax.f32 %v413_v6, %v416_v12  ;;  %v262_v63 = vmul.f32 1.442695, %v229_v9  ;;  %v433_v7 = vsel %vm167_vm1, %v1356_v21, -inf }
  0x93   :  { %v228_v32 = vsub.f32 %v1125_v34, %v1345_v60  ;;  %v231_v10 = vsub.f32 %v1130_v35, %v1345_v60  ;;  %v1376_v34 = vmax.f32 %v428_v53, %v431_v16  ;;  %v1381_v35 = vld [vmem:[%s2121_s2 + $0xd8] sm:$0xff]  ;;  %v1390_v6 = vld [vmem:[%s2121_s2 + $0xb0] sm:$0xff]  ;;  %v233_v4 = vsub.f32 %v1074_v15, %v1291_v61 }
  0x94   :  { %2162 = vst [vmem:[#allocation15_spill] sm:$0xff] %v1381_v35  ;;  %2163 = vst [vmem:[#allocation16_spill] sm:$0xff] %v1390_v6  ;;  %833 = vpow2.f32 %v256_v13  ;;  %v264_v53 = vmul.f32 1.442695, %v230_v25  ;;  %v419_v8 = vmax.f32 %v415_v31, %v418_v38  ;;  %v234_v12 = vsub.f32 %v1149_v42, %v1345_v60 }
  0x95   :  { %v260_v62 = vmul.f32 1.442695, %v228_v32  ;;  %835 = vpow2.f32 %v258_v33  ;;  %v266_v14 = vmul.f32 1.442695, %v231_v10  ;;  %v420_v9 = vsel %vm167_vm1, %v1374_v11, -inf }
  0x96   :  { %v422_v16 = vsel %vm167_vm1, %v1381_v35, -inf  ;;  %v1400_v32 = vmax.f32 %v430_v48, %v433_v7  ;;  %v1404_v15 = vsel %vm167_vm1, %v1369_v55, -inf  ;;  %v235_v25 = vsub.f32 %v1083_v18, %v1283_v54 }
  0x97   :  { %837 = vpow2.f32 %v260_v62  ;;  %v268_v42 = vmul.f32 1.442695, %v232_v56  ;;  %v1410_v13 = vsel %vm167_vm1, %v1390_v6, -inf  ;;  %v236_v31 = vsub.f32 %v1088_v19, %v1291_v61 }
  0x98   :  { %839 = vpow2.f32 %v262_v63  ;;  %v270_v10 = vmul.f32 1.442695, %v233_v4  ;;  %v1414_v7 = vmax.f32 %v417_v47, %v420_v9  ;;  %v237_v33 = vsub.f32 %v1154_v43, %v1345_v60 }
  0x99   :  { %841 = vpow2.f32 %v264_v53  ;;  %v272_v38 = vmul.f32 1.442695, %v234_v12  ;;  %v238_v48 = vsub.f32 %v1097_v22, %v1283_v54  ;;  %v239_v56 = vsub.f32 %v1102_v23, %v1291_v61 }
  0x9a   :  { %843 = vpow2.f32 %v266_v14  ;;  %v1424_v62 = vmax.f32 %v419_v8, %v422_v16  ;;  %v241_v47 = vsub.f32 %v1111_v28, %v1283_v54  ;;  %v242_v43 = vsub.f32 %v1116_v29, %v1291_v61  ;;  %v1470_v14 = vld [vmem:[%s2121_s2 + $0x58] sm:$0x7] }
  0x9b   :  { %845 = vpow2.f32 %v268_v42  ;;  %v274_v63 = vmul.f32 1.442695, %v235_v25  ;;  %v244_v4 = vsub.f32 %v1135_v36, %v1283_v54  ;;  %v245_v22 = vsub.f32 %v1140_v37, %v1291_v61 }
  0x9c   :  { %847 = vpow2.f32 %v270_v10  ;;  %v276_v23 = vmul.f32 1.442695, %v236_v31  ;;  %v240_v53 = vsub.f32 %v1173_v50, %v1345_v60  ;;  %v247_v8 = vsub.f32 %v1159_v44, %v1283_v54  ;;  %v1451_v50 = vld [vmem:[%s2121_s2 + $0x10] sm:$0x7]  ;;  %v1456_v44 = vld [vmem:[%s2121_s2 + $0x28] sm:$0x7] }
  0x9d   :  { %849 = vpow2.f32 %v272_v38  ;;  %v278_v28 = vmul.f32 1.442695, %v237_v33  ;;  %v243_v29 = vsub.f32 %v1192_v57, %v1345_v60  ;;  %v248_v12 = vsub.f32 %v1164_v45, %v1291_v61  ;;  %v1485_v33 = vld [vmem:[%s2121_s2 + $0x70] sm:$0x7] }
  0x9e   :  { %v250_v36 = vsub.f32 %v1178_v51, %v1283_v54  ;;  %v251_v37 = vsub.f32 %v1183_v52, %v1291_v61  ;;  %v253_v57 = vsub.f32 %v1197_v58, %v1283_v54  ;;  %851 = vpow2.f32 %v274_v63  ;;  %v1465_v52 = vld [vmem:[%s2121_s2 + $0x40] sm:$0x7] }
  0x9f   :  { %v280_v51 = vmul.f32 1.442695, %v238_v48  ;;  %v246_v9 = vsub.f32 %v1230_v17, %v1345_v60  ;;  %v249_v58 = vsub.f32 %v1235_v20, %v1345_v60  ;;  %853 = vpow2.f32 %v276_v23 }
  0xa0   :  { %v282_v54 = vmul.f32 1.442695, %v239_v56  ;;  %v252_v25 = vsub.f32 %v1262_v39, %v1345_v60  ;;  %855 = vpow2.f32 %v278_v28  ;;  %v284_v42 = vmul.f32 1.442695, %v240_v53  ;;  %v1496_v39 = vld [vmem:[%s2121_s2 + $0x88] sm:$0x7] }
  0xa1   :  { %v1476_v16 = vpop.eup %833  ;;  %v286_v31 = vmul.f32 1.442695, %v241_v47  ;;  %v288_v20 = vmul.f32 1.442695, %v242_v43  ;;  %v290_v38 = vmul.f32 1.442695, %v243_v29  ;;  %857 = vpow2.f32 %v280_v51 }
  0xa2   :  { %2164 = vst [vmem:[#allocation17_spill] sm:$0xff] %v1476_v16  ;;  %v1480_v10 = vpop.eup %835  ;;  %v444_v48 = vsel %vm206_vm2, %v1451_v50, -inf  ;;  %v445_v47 = vsel %vm206_vm2, %v1456_v44, -inf  ;;  %v446_v63 = vsel %vm206_vm2, %v1465_v52, -inf  ;;  %v448_v43 = vsel %vm206_vm2, %v1470_v14, -inf }
  0xa3   :  { %2165 = vst [vmem:[#allocation18_spill] sm:$0xff] %v1480_v10  ;;  %859 = vpow2.f32 %v282_v54  ;;  %v292_v53 = vmul.f32 1.442695, %v244_v4  ;;  %v294_v28 = vmul.f32 1.442695, %v245_v22  ;;  %v447_v6 = vmax.f32 %v444_v48, %v446_v63  ;;  %v1549_v63 = vld [vmem:[%s2121_s2 + $0xc8] sm:$0xff] }
  0xa4   :  { %v1491_v56 = vpop.eup %837  ;;  %v296_v29 = vmul.f32 1.442695, %v246_v9  ;;  %861 = vpow2.f32 %v284_v42  ;;  %v298_v19 = vmul.f32 1.442695, %v247_v8  ;;  %v300_v51 = vmul.f32 1.442695, %v248_v12 }
  0xa5   :  { %2166 = vst [vmem:[#allocation19_spill] sm:$0xff] %v1491_v56  ;;  %v1504_v23 = vpop.eup %839  ;;  %v302_v18 = vmul.f32 1.442695, %v249_v58  ;;  %v1510_v35 = vmul.f32 1.442695, %v250_v36  ;;  %v449_v55 = vmax.f32 %v445_v47, %v448_v43  ;;  %863 = vpow2.f32 %v286_v31 }
  0xa6   :  { %2167 = vst [vmem:[#allocation20_spill] sm:$0xff] %v1504_v23  ;;  %v1506_v17 = vpop.eup %841  ;;  %v1512_v11 = vmul.f32 1.442695, %v251_v37  ;;  %v1517_v4 = vld [vmem:[%s2121_s2 + $0xa0] sm:$0x7]  ;;  %v316_v22 = vsel %vm167_vm1, %v1476_v16, 0.0  ;;  %865 = vpow2.f32 %v288_v20 }
  0xa7   :  { %2168 = vst [vmem:[#allocation21_spill] sm:$0xff] %v1506_v17  ;;  %v1508_v45 = vpop.eup %843  ;;  %2170 = vst [vmem:[#allocation23_spill] sm:$0xff] %v1517_v4  ;;  %v317_v8 = vsel %vm167_vm1, %v1504_v23, 0.0  ;;  %v450_v12 = vsel %vm206_vm2, %v1485_v33, -inf  ;;  %v335_v37 = vsel %vm167_vm1, %v1480_v10, 0.0  ;;  %v336_v9 = vsel %vm167_vm1, %v1506_v17, 0.0 }
  0xa8   :  { %2169 = vst [vmem:[#allocation22_spill] sm:$0xff] %v1508_v45  ;;  %v1525_v36 = vpop.eup %845  ;;  %v452_v58 = vsel %vm206_vm2, %v1496_v39, -inf  ;;  %v1538_v42 = vld [vmem:[%s2121_s2 + $0xb8] sm:$0x7]  ;;  %867 = vpow2.f32 %v290_v38  ;;  %v308_v31 = vmul.f32 1.442695, %v252_v25  ;;  %v318_v17 = vadd.f32 %v317_v8, %v316_v22 }
  0xa9   :  { %2171 = vst [vmem:[#allocation24_spill] sm:$0xff] %v1525_v36  ;;  %v1533_v54 = vpop.eup %847  ;;  %v354_v20 = vsel %vm206_vm2, %v1491_v56, 0.0  ;;  %v355_v48 = vsel %vm206_vm2, %v1508_v45, 0.0  ;;  %v310_v43 = vmul.f32 1.442695, %v253_v57  ;;  %v451_v23 = vmax.f32 %v447_v6, %v450_v12  ;;  %v1561_v45 = vld [vmem:[%s2121_s2 + $0xe0] sm:$0xff] }
  0xaa   :  { %2172 = vst [vmem:[#allocation25_spill] sm:$0xff] %v1533_v54  ;;  %v1544_v47 = vpop.eup %849  ;;  %v454_v38 = vsel %vm206_vm2, %v1517_v4, -inf  ;;  %v1556_v25 = vld [vmem:[%s2121_s2 + $0xd0] sm:$0x7]  ;;  %869 = vpow2.f32 %v292_v53  ;;  %v319_v56 = vsel %vm167_vm1, %v1525_v36, 0.0  ;;  %v337_v57 = vadd.f32 %v336_v9, %v335_v37 }
  0xab   :  { %2173 = vst [vmem:[#allocation26_spill] sm:$0xff] %v1544_v47  ;;  %v453_v22 = vmax.f32 %v449_v55, %v452_v58  ;;  %v1565_v6 = vpop.eup %851  ;;  %871 = vpow2.f32 %v294_v28  ;;  %v338_v8 = vsel %vm167_vm1, %v1533_v54, 0.0  ;;  %v356_v12 = vadd.f32 %v355_v48, %v354_v20  ;;  %v1585_v9 = vld [vmem:[%s2121_s2 + $0xe8] sm:$0x7] }
  0xac   :  { %v456_v10 = vsel %vm206_vm2, %v1538_v42, -inf  ;;  %v1571_v16 = vpop.eup %853  ;;  %873 = vpow2.f32 %v296_v29  ;;  %v2174_v53 = vsub.f32 %v1202_v59, %v1291_v61  ;;  %v357_v55 = vsel %vm206_vm2, %v1544_v47, 0.0 }
  0xad   :  { %v439_v28 = vsel %vm167_vm1, %v1549_v63, -inf  ;;  %v1580_v37 = vpop.eup %855  ;;  %v320_v58 = vadd.f32 %v319_v56, %v318_v17  ;;  %v441_v29 = vsel %vm167_vm1, %v1561_v45, -inf  ;;  %v455_v20 = vmax.f32 %v451_v23, %v454_v38 }
  0xae   :  { %v312_v4 = vmul.f32 1.442695, %v2174_v53  ;;  %v458_v59 = vsel %vm206_vm2, %v1556_v25, -inf  ;;  %875 = vpow2.f32 %v298_v19  ;;  %v321_v48 = vsel %vm167_vm1, %v1565_v6, 0.0  ;;  %v1593_v54 = vpop.eup %857 }
  0xaf   :  { %v339_v53 = vadd.f32 %v338_v8, %v337_v57  ;;  %v457_v47 = vmax.f32 %v453_v22, %v456_v10  ;;  %877 = vpow2.f32 %v300_v51  ;;  %v340_v17 = vsel %vm167_vm1, %v1571_v16, 0.0 }
  0xb0   :  { %v358_v56 = vadd.f32 %v357_v55, %v356_v12  ;;  %v1598_v23 = vpop.eup %859  ;;  %879 = vpow2.f32 %v302_v18  ;;  %v359_v19 = vsel %vm206_vm2, %v1580_v37, 0.0  ;;  %v2175_v38 = vmax.f32 %v1376_v34, %v1404_v15 }
  0xb1   :  { %v460_v10 = vsel %vm206_vm2, %v1585_v9, -inf  ;;  %v1607_v22 = vpop.eup %861  ;;  %881 = vpow2.f32 %v1510_v35  ;;  %v322_v8 = vadd.f32 %v321_v48, %v320_v58  ;;  %v2176_v12 = vmax.f32 %v1400_v32, %v1410_v13 }
  0xb2   :  { %v440_v57 = vmax.f32 %v2175_v38, %v439_v28  ;;  %883 = vpow2.f32 %v1512_v11  ;;  %v323_v55 = vsel %vm167_vm1, %v1593_v54, 0.0  ;;  %v341_v34 = vadd.f32 %v340_v17, %v339_v53  ;;  %v1616_v28 = vpop.eup %863 }
  0xb3   :  { %v442_v18 = vmax.f32 %v2176_v12, %v441_v29  ;;  %v459_v15 = vmax.f32 %v455_v20, %v458_v59  ;;  %v461_v35 = vmax.f32 %v457_v47, %v460_v10  ;;  %v1620_v58 = vpop.eup %865  ;;  %v2177_v32 = vsub.f32 %v1267_v40, %v1345_v60 }
  0xb4   :  { %v361_v13 = vsel %vm206_vm2, %v1607_v22, 0.0  ;;  %v324_v20 = vadd.f32 %v323_v55, %v322_v8  ;;  %v1631_v59 = vmax.f32 %v1414_v7, %v1424_v62  ;;  %v325_v47 = vsel %vm167_vm1, %v1616_v28, 0.0 }
  0xb5   :  { %v314_v11 = vmul.f32 1.442695, %v2177_v32  ;;  %v1627_v29 = vpop.eup %867  ;;  %v344_v40 = vsel %vm167_vm1, %v1620_v58, 0.0  ;;  %v1641_v17 = vmax.f32 %v459_v15, %v461_v35 }
  0xb6   :  { %v363_v7 = vsel %vm206_vm2, %v1627_v29, 0.0  ;;  %v1673_v55 = vsub.f32 %v1216_v2, %v1631_v59  ;;  %v1692_v32 = vsub.f32 %v1221_v3, %v1631_v59 }
  0xb7   :  { %v1637_v53 = vpop.eup %869  ;;  %v1665_v12 = vsub.f32 %v1451_v50, %v1641_v17  ;;  %v1683_v50 = vsub.f32 %v1456_v44, %v1641_v17  ;;  %v1708_v3 = vsub.f32 %v1465_v52, %v1641_v17  ;;  %v28_v52 = vld [vmem:[%s2120_s1] sm:$0xff] }
 0x109   :  { %v61_v61 = vpop.permute.xlu0 %60 }
 0x10a   :  { %v63_v36 = vsub.f32 %v1025_v0, %v61_v61  ;;  %v360_v61 = vadd.f32 %v359_v19, %v358_v56  ;;  %v1643_v56 = vpop.eup %871  ;;  %v1651_v19 = vsub.f32 %v1211_v1, %v1631_v59 }
 0x10b   :  { %2178 = vst [vmem:[#allocation27_spill] sm:$0xff] %v1643_v56  ;;  %v1647_v62 = vpop.eup %873 }
 0x10c   :  { %v64_v51 = vmul.f32 1.442695, %v63_v36  ;;  %v342_v36 = vsel %vm167_vm1, %v1598_v23, 0.0  ;;  %v362_v60 = vadd.f32 %v361_v13, %v360_v61  ;;  %2179 = vst [vmem:[#allocation28_spill] sm:$0xff] %v1647_v62  ;;  %v1659_v10 = vpop.eup %875 }
 0x10d   :  { %v343_v48 = vadd.f32 %v342_v36, %v341_v34  ;;  %2180 = vst [vmem:[#allocation29_spill] sm:$0xff] %v1659_v10  ;;  %v1667_v1 = vpop.eup %877  ;;  %v493_v36 = vmul.f32 1.442695, %v1651_v19  ;;  %v329_v35 = vsel %vm167_vm1, %v1659_v10, 0.0 }
 0x10e   :  { %885 = vpow2.f32 %v64_v51  ;;  %v346_v51 = vsel %vm167_vm1, %v1643_v56, 0.0  ;;  %v364_v8 = vadd.f32 %v363_v7, %v362_v60  ;;  %2181 = vst [vmem:[#allocation30_spill] sm:$0xff] %v1667_v1  ;;  %v348_v44 = vsel %vm167_vm1, %v1667_v1, 0.0 }
 0x10f   :  { %887 = vpow2.f32 %v308_v31  ;;  %v1635_v31 = vmax.f32 %v440_v57, %v442_v18  ;;  %v345_v38 = vadd.f32 %v344_v40, %v343_v48  ;;  %v365_v18 = vsel %vm206_vm2, %v1647_v62, 0.0 }
 0x110   :  { %889 = vpow2.f32 %v310_v43  ;;  %v326_v43 = vadd.f32 %v325_v47, %v324_v20  ;;  %v366_v13 = vadd.f32 %v365_v18, %v364_v8  ;;  %v497_v47 = vmul.f32 1.442695, %v1665_v12 }
 0x111   :  { %891 = vpow2.f32 %v312_v4  ;;  %v327_v4 = vsel %vm167_vm1, %v1637_v53, 0.0  ;;  %v1657_v57 = vsub.f32 %v1244_v27, %v1635_v31  ;;  %v1675_v27 = vpop.eup %879  ;;  %v1679_v15 = vsub.f32 %v1309_v24, %v1635_v31 }
 0x112   :  { %893 = vpow2.f32 %v314_v11  ;;  %2182 = vst [vmem:[#allocation31_spill] sm:$0xff] %v1675_v27  ;;  %v328_v34 = vadd.f32 %v327_v4, %v326_v43  ;;  %v1686_v61 = vpop.eup %881  ;;  %v347_v2 = vadd.f32 %v346_v51, %v345_v38  ;;  %v1701_v20 = vsub.f32 %v1276_v49, %v1635_v31 }
 0x113   :  { %2183 = vst [vmem:[#allocation32_spill] sm:$0xff] %v1686_v61  ;;  %v495_v11 = vmul.f32 1.442695, %v1657_v57  ;;  %v1695_v24 = vpop.eup %883  ;;  %v367_v40 = vsel %vm206_vm2, %v1675_v27, 0.0  ;;  %v1712_v60 = vsub.f32 %v1249_v30, %v1631_v59  ;;  %v499_v7 = vmul.f32 1.442695, %v1673_v55 }
 0x114   :  { %2184 = vst [vmem:[#allocation33_spill] sm:$0xff] %v1695_v24  ;;  %v330_v49 = vadd.f32 %v329_v35, %v328_v34  ;;  %v1719_v4 = vsub.f32 %v1314_v26, %v1635_v31  ;;  %895 = vpow2.f32 %v493_v36  ;;  %v501_v38 = vmul.f32 1.442695, %v1679_v15 }
 0x115   :  { %v331_v30 = vsel %vm167_vm1, %v1686_v61, 0.0  ;;  %v349_v51 = vadd.f32 %v348_v44, %v347_v2  ;;  %897 = vpow2.f32 %v495_v11  ;;  %v503_v8 = vmul.f32 1.442695, %v1683_v50 }
 0x116   :  { %v350_v26 = vsel %vm167_vm1, %v1695_v24, 0.0  ;;  %v368_v34 = vadd.f32 %v367_v40, %v366_v13  ;;  %899 = vpow2.f32 %v497_v47  ;;  %v505_v36 = vmul.f32 1.442695, %v1692_v32 }
 0x117   :  { %901 = vpow2.f32 %v499_v7  ;;  %v507_v2 = vmul.f32 1.442695, %v1701_v20  ;;  %v73_v44 = vmul.f32 %v28_v52, %v1025_v0  ;;  %v332_v61 = vadd.f32 %v331_v30, %v330_v49 }
 0x118   :  { %903 = vpow2.f32 %v501_v38  ;;  %v509_v13 = vmul.f32 1.442695, %v1708_v3  ;;  %v351_v40 = vadd.f32 %v350_v26, %v349_v51  ;;  %v511_v24 = vmul.f32 1.442695, %v1712_v60 }
 0x119   :  { %905 = vpow2.f32 %v503_v8  ;;  %v513_v27 = vmul.f32 1.442695, %v1719_v4  ;;  %v1752_v49 = vsub.f32 %v1470_v14, %v1641_v17  ;;  %v1760_v8 = vsub.f32 %v1323_v41, %v1635_v31 }
 0x11a   :  { %907 = vpow2.f32 %v505_v36  ;;  %v1768_v14 = vsub.f32 %v1298_v5, %v1631_v59  ;;  %v1776_v36 = vsub.f32 %v1496_v39, %v1641_v17  ;;  %v2193_v39 = vld [vmem:[#allocation12_spill] sm:$0xff] }
 0x11b   :  { %v886_v48 = vpop.eup %885  ;;  %909 = vpow2.f32 %v507_v2  ;;  %v515_v41 = vmul.f32 1.442695, %v1752_v49  ;;  %v1794_v2 = vsub.f32 %v2193_v39, %v1631_v59 }
 0x11c   :  { %v1715_v43 = vpop.eup %887  ;;  %66 = vadd.xlane.f32.xlu1 %v886_v48  ;;  %911 = vpow2.f32 %v509_v13  ;;  %2188 = vst [vmem:[#allocation35_spill] sm:$0xff] %v1776_v36  ;;  %v2194_v13 = vld [vmem:[#allocation16_spill] sm:$0xff] }
 0x11d   :  { %2185 = vst [vmem:[#allocation34_spill] sm:$0xff] %v1715_v43  ;;  %v1728_v18 = vpop.eup %889  ;;  %v369_v48 = vsel %vm206_vm2, %v1715_v43, 0.0  ;;  %913 = vpow2.f32 %v511_v24 }
 0x11e   :  { %v1733_v35 = vpop.eup %891  ;;  %v333_v47 = vsel %vm167_vm1, %v1728_v18, 0.0  ;;  %v370_v43 = vadd.f32 %v369_v48, %v368_v34  ;;  %v1764_v34 = vsub.f32 %v1485_v33, %v1641_v17  ;;  %915 = vpow2.f32 %v513_v27  ;;  %v2190_v27 = vld [vmem:[#allocation13_spill] sm:$0xff] }
 0x11f   :  { %v1738_v11 = vpop.eup %893  ;;  %v352_v7 = vsel %vm167_vm1, %v1733_v35, 0.0  ;;  %v334_v38 = vadd.f32 %v333_v47, %v332_v61  ;;  %v1772_v61 = vsub.f32 %v1356_v21, %v1635_v31  ;;  %v1781_v33 = vsub.f32 %v1328_v46, %v1631_v59  ;;  %v2192_v21 = vld [vmem:[#allocation23_spill] sm:$0xff] }
 0x120   :  { %79 = vadd.xlane.f32.xlu1 %v28_v52  ;;  %v371_v0 = vsel %vm206_vm2, %v1738_v11, 0.0  ;;  %v2186_v52 = vld [vmem:[#allocation11_spill] sm:$0xff]  ;;  %v353_v51 = vadd.f32 %v352_v7, %v351_v40  ;;  %v1785_v24 = vsub.f32 %v2190_v27, %v1635_v31  ;;  %v1790_v48 = vsub.f32 %v2192_v21, %v1641_v17 }
 0x121   :  { %v1756_v30 = vsub.f32 %v2186_v52, %v1631_v59  ;;  %v372_v26 = vadd.f32 %v371_v0, %v370_v43  ;;  %2187 = vst [vmem:[#allocation11_spill] sm:$0xff] %v1772_v61  ;;  %917 = vrcp.f32 %v334_v38  ;;  %2189 = vst [vmem:[#allocation36_spill] sm:$0xff] %v1781_v33  ;;  %v896_v43 = vpop.eup %895  ;;  %v1799_v47 = vsub.f32 %v2194_v13, %v1635_v31  ;;  %v2195_v38 = vld [vmem:[#allocation14_spill] sm:$0xff] }
 0x122   :  { %2191 = vst [vmem:[#allocation13_spill] sm:$0xff] %v1785_v24  ;;  %919 = vrcp.f32 %v353_v51  ;;  %v898_v46 = vpop.eup %897  ;;  %v1803_v40 = vsub.f32 %v1538_v42, %v1641_v17  ;;  %v521_v7 = vmul.f32 1.442695, %v1764_v34  ;;  %v1808_v52 = vsub.f32 %v2195_v38, %v1631_v59 }
 0x123   :  { %v517_v5 = vmul.f32 1.442695, %v1756_v30  ;;  %921 = vrcp.f32 %v372_v26  ;;  %v900_v0 = vpop.eup %899  ;;  %v1812_v51 = vsub.f32 %v1549_v63, %v1635_v31  ;;  %v523_v26 = vmul.f32 1.442695, %v1768_v14 }
 0x124   :  { %74 = vadd.xlane.f32.xlu1 %v73_v44  ;;  %v519_v44 = vmul.f32 1.442695, %v1760_v8  ;;  %923 = vpow2.f32 %v515_v41  ;;  %v902_v27 = vpop.eup %901  ;;  %v1817_v21 = vsub.f32 %v1556_v25, %v1641_v17  ;;  %v525_v42 = vmul.f32 1.442695, %v1772_v61 }
 0x125   :  { %925 = vpow2.f32 %v517_v5  ;;  %v553_v39 = vsel %vm167_vm1, %v896_v43, 0.0  ;;  %v904_v13 = vpop.eup %903  ;;  %v527_v38 = vmul.f32 1.442695, %v1776_v36  ;;  %v554_v63 = vsel %vm167_vm1, %v902_v27, 0.0 }
 0x126   :  { %927 = vpow2.f32 %v519_v44  ;;  %v572_v41 = vsel %vm167_vm1, %v898_v46, 0.0  ;;  %v906_v1 = vpop.eup %905  ;;  %v529_v10 = vmul.f32 1.442695, %v1781_v33  ;;  %v531_v25 = vmul.f32 1.442695, %v1785_v24  ;;  %v2196_v33 = vld [vmem:[#allocation15_spill] sm:$0xff] }
 0x127   :  { %929 = vpow2.f32 %v521_v7  ;;  %v573_v5 = vsel %vm167_vm1, %v904_v13, 0.0  ;;  %v908_v62 = vpop.eup %907  ;;  %v555_v56 = vadd.f32 %v554_v63, %v553_v39  ;;  %v591_v43 = vsel %vm206_vm2, %v900_v0, 0.0 }
 0x128   :  { %931 = vpow2.f32 %v523_v26  ;;  %v592_v44 = vsel %vm206_vm2, %v906_v1, 0.0  ;;  %v910_v36 = vpop.eup %909  ;;  %v533_v27 = vmul.f32 1.442695, %v1790_v48  ;;  %v556_v46 = vsel %vm167_vm1, %v908_v62, 0.0 }
 0x129   :  { %933 = vpow2.f32 %v525_v42  ;;  %v574_v7 = vadd.f32 %v573_v5, %v572_v41  ;;  %v912_v61 = vpop.eup %911  ;;  %v1833_v24 = vsub.f32 %v2196_v33, %v1631_v59  ;;  %v535_v26 = vmul.f32 1.442695, %v1794_v2 }
 0x12a   :  { %935 = vpow2.f32 %v527_v38  ;;  %v575_v39 = vsel %vm167_vm1, %v910_v36, 0.0  ;;  %v914_v0 = vpop.eup %913  ;;  %v1839_v1 = vsub.f32 %v1561_v45, %v1635_v31  ;;  %v537_v42 = vmul.f32 1.442695, %v1799_v47 }
 0x12b   :  { %937 = vpow2.f32 %v529_v10  ;;  %v593_v62 = vadd.f32 %v592_v44, %v591_v43  ;;  %v916_v13 = vpop.eup %915  ;;  %v539_v63 = vmul.f32 1.442695, %v1803_v40  ;;  %v557_v59 = vadd.f32 %v556_v46, %v555_v56 }
 0x12c   :  { %2197 = vst [vmem:[#allocation23_spill] sm:$0xff] %v1839_v1  ;;  %939 = vpow2.f32 %v531_v25  ;;  %v594_v33 = vsel %vm206_vm2, %v912_v61, 0.0  ;;  %v541_v38 = vmul.f32 1.442695, %v1808_v52  ;;  %v558_v36 = vsel %vm167_vm1, %v914_v0, 0.0 }
 0x12d   :  { %941 = vpow2.f32 %v533_v27  ;;  %v576_v41 = vadd.f32 %v575_v39, %v574_v7  ;;  %v1850_v45 = vsub.f32 %v1585_v9, %v1641_v17  ;;  %v543_v31 = vmul.f32 1.442695, %v1812_v51 }
 0x12e   :  { %v1846_v5 = vpop.eup %917  ;;  %943 = vpow2.f32 %v535_v26  ;;  %v577_v10 = vsel %vm167_vm1, %v916_v13, 0.0  ;;  %v545_v61 = vmul.f32 1.442695, %v1817_v21  ;;  %v595_v25 = vadd.f32 %v594_v33, %v593_v62 }
 0x12f   :  { %2198 = vst [vmem:[#allocation12_spill] sm:$0xff] %v1850_v45  ;;  %v1854_v56 = vpop.eup %919  ;;  %945 = vpow2.f32 %v537_v42  ;;  %v547_v44 = vmul.f32 1.442695, %v1833_v24  ;;  %v559_v27 = vadd.f32 %v558_v36, %v557_v59  ;;  %v549_v9 = vmul.f32 1.442695, %v1839_v1 }
 0x130   :  { %v1857_v43 = vpop.eup %921  ;;  %947 = vpow2.f32 %v539_v63  ;;  %v578_v17 = vadd.f32 %v577_v10, %v576_v41  ;;  %v551_v26 = vmul.f32 1.442695, %v1850_v45 }
 0x131   :  { %v924_v46 = vpop.eup %923  ;;  %949 = vpow2.f32 %v541_v38 }
 0x132   :  { %v926_v7 = vpop.eup %925  ;;  %951 = vpow2.f32 %v543_v31  ;;  %v596_v39 = vsel %vm206_vm2, %v924_v46, 0.0  ;;  %v1868_v31 = vmul.f32 %v1846_v5, %v1728_v18 }
 0x133   :  { %v928_v0 = vpop.eup %927  ;;  %953 = vpow2.f32 %v545_v61  ;;  %v560_v42 = vsel %vm167_vm1, %v926_v7, 0.0  ;;  %v597_v62 = vadd.f32 %v596_v39, %v595_v25 }
 0x134   :  { %v930_v13 = vpop.eup %929  ;;  %955 = vpow2.f32 %v547_v44  ;;  %v561_v63 = vadd.f32 %v560_v42, %v559_v27  ;;  %v579_v59 = vsel %vm167_vm1, %v928_v0, 0.0  ;;  %v1880_v42 = vmul.f32 %v1857_v43, %v1738_v11 }
 0x135   :  { %v932_v33 = vpop.eup %931  ;;  %957 = vpow2.f32 %v549_v9  ;;  %v580_v38 = vadd.f32 %v579_v59, %v578_v17  ;;  %v598_v36 = vsel %vm206_vm2, %v930_v13, 0.0  ;;  %v1874_v9 = vmul.f32 %v1854_v56, %v1733_v35 }
 0x136   :  { %v934_v41 = vpop.eup %933  ;;  %959 = vpow2.f32 %v551_v26  ;;  %v562_v10 = vsel %vm167_vm1, %v932_v33, 0.0  ;;  %v599_v61 = vadd.f32 %v598_v36, %v597_v62  ;;  %2199 = vst [vmem:[#allocation16_spill] sm:$0xff] %v1880_v42 }
 0x137   :  { %v936_v25 = vpop.eup %935  ;;  %v563_v46 = vadd.f32 %v562_v10, %v561_v63  ;;  %v581_v44 = vsel %vm167_vm1, %v934_v41, 0.0 }
 0x138   :  { %v938_v27 = vpop.eup %937  ;;  %v582_v17 = vadd.f32 %v581_v44, %v580_v38  ;;  %v600_v7 = vsel %vm206_vm2, %v936_v25, 0.0 }
 0x139   :  { %v940_v39 = vpop.eup %939  ;;  %v564_v18 = vsel %vm167_vm1, %v938_v27, 0.0  ;;  %v601_v0 = vadd.f32 %v600_v7, %v599_v61 }
 0x13a   :  { %v942_v26 = vpop.eup %941  ;;  %v583_v62 = vsel %vm167_vm1, %v940_v39, 0.0  ;;  %v565_v63 = vadd.f32 %v564_v18, %v563_v46 }
 0x13b   :  { %v944_v13 = vpop.eup %943  ;;  %v602_v59 = vsel %vm206_vm2, %v942_v26, 0.0  ;;  %v584_v38 = vadd.f32 %v583_v62, %v582_v17 }
 0x13c   :  { %v946_v35 = vpop.eup %945  ;;  %v566_v33 = vsel %vm167_vm1, %v944_v13, 0.0  ;;  %v603_v10 = vadd.f32 %v602_v59, %v601_v0 }
 0x13d   :  { %v948_v36 = vpop.eup %947  ;;  %v585_v41 = vsel %vm167_vm1, %v946_v35, 0.0  ;;  %v567_v11 = vadd.f32 %v566_v33, %v565_v63 }
 0x13e   :  { %v950_v61 = vpop.eup %949  ;;  %v604_v25 = vsel %vm206_vm2, %v948_v36, 0.0  ;;  %v586_v39 = vadd.f32 %v585_v41, %v584_v38 }
 0x13f   :  { %v952_v44 = vpop.eup %951  ;;  %v568_v7 = vsel %vm167_vm1, %v950_v61, 0.0  ;;  %v605_v26 = vadd.f32 %v604_v25, %v603_v10 }
 0x140   :  { %v954_v27 = vpop.eup %953  ;;  %v587_v18 = vsel %vm167_vm1, %v952_v44, 0.0  ;;  %v569_v13 = vadd.f32 %v568_v7, %v567_v11  ;;  %v35_v44 = vlaneseq }
 0x141   :  { %v956_v46 = vpop.eup %955  ;;  %v606_v17 = vsel %vm206_vm2, %v954_v27, 0.0  ;;  %v588_v59 = vadd.f32 %v587_v18, %v586_v39  ;;  %v2200_v27 = vld [vmem:[#allocation17_spill] sm:$0xff]  ;;  %v2201_v39 = vld [vmem:[#allocation18_spill] sm:$0xff] }
 0x142   :  { %v958_v45 = vpop.eup %957  ;;  %v570_v0 = vsel %vm167_vm1, %v956_v46, 0.0  ;;  %v607_v36 = vadd.f32 %v606_v17, %v605_v26  ;;  %v376_v11 = vmul.f32 %v1846_v5, %v2200_v27  ;;  %v2202_v46 = vld [vmem:[#allocation19_spill] sm:$0xff] }
 0x143   :  { %v960_v62 = vpop.eup %959  ;;  %v589_v35 = vsel %vm167_vm1, %v958_v45, 0.0  ;;  %v571_v33 = vadd.f32 %v570_v0, %v569_v13  ;;  %v377_v45 = vmul.f32 %v1854_v56, %v2201_v39  ;;  %v378_v18 = vmul.f32 %v1857_v43, %v2202_v46  ;;  %v2206_v39 = vld [vmem:[#allocation24_spill] sm:$0xff] }
 0x144   :  { %v608_v63 = vsel %vm206_vm2, %v960_v62, 0.0  ;;  %v590_v61 = vadd.f32 %v589_v35, %v588_v59  ;;  %v2203_v62 = vld [vmem:[#allocation20_spill] sm:$0xff]  ;;  %v1907_v0 = vand.u32 127, %v35_v44  ;;  %v2204_v59 = vld [vmem:[#allocation21_spill] sm:$0xff] }
 0x145   :  { %v609_v38 = vadd.f32 %v608_v63, %v607_v36  ;;  %961 = vlog2.f32 %v571_v33  ;;  %v379_v13 = vmul.f32 %v1846_v5, %v2203_v62  ;;  %v380_v35 = vmul.f32 %v1854_v56, %v2204_v59 }
 0x146   :  { %963 = vlog2.f32 %v590_v61  ;;  %v646_v63 = vsub.f32 0.0, %v376_v11  ;;  %vm166_vm3 = vcmp.lt.s32.totalorder %v1907_v0, 8 }
 0x147   :  { %965 = vlog2.f32 %v609_v38  ;;  %v647_v38 = vsub.f32 0.0, %v377_v45  ;;  %v649_v27 = vsub.f32 0.0, %v379_v13  ;;  %v650_v46 = vsub.f32 0.0, %v380_v35 }
 0x152   :  { %v962_v41 = vpop.eup %961 }
 0x153   :  { %v964_v10 = vpop.eup %963  ;;  %v1895_v7 = vmul.f32 0.6931472, %v962_v41  ;;  %v648_v41 = vsub.f32 0.0, %v378_v18  ;;  %v2207_v18 = vld [vmem:[#allocation25_spill] sm:$0xff] }
 0x154   :  { %v966_v25 = vpop.eup %965  ;;  %v1901_v26 = vmul.f32 0.6931472, %v964_v10  ;;  %v2205_v10 = vld [vmem:[#allocation22_spill] sm:$0xff]  ;;  %v383_v62 = vmul.f32 %v1854_v56, %v2207_v18 }
 0x155   :  { %v1903_v17 = vmul.f32 0.6931472, %v966_v25  ;;  %v616_v36 = vsub.f32 %v1651_v19, %v1895_v7  ;;  %v381_v25 = vmul.f32 %v1857_v43, %v2205_v10  ;;  %v619_v44 = vsub.f32 %v1673_v55, %v1895_v7  ;;  %v2208_v10 = vld [vmem:[#allocation26_spill] sm:$0xff] }
 0x156   :  { %v617_v33 = vsub.f32 %v1657_v57, %v1901_v26  ;;  %v382_v19 = vmul.f32 %v1846_v5, %v2206_v39  ;;  %v620_v57 = vsub.f32 %v1679_v15, %v1901_v26  ;;  %v384_v42 = vmul.f32 %v1857_v43, %v2208_v10 }
 0x157   :  { %v618_v61 = vsub.f32 %v1665_v12, %v1903_v17  ;;  %v676_v11 = vmul.f32 %v646_v63, %v616_v36  ;;  %v621_v59 = vsub.f32 %v1683_v50, %v1903_v17  ;;  %v651_v55 = vsub.f32 0.0, %v381_v25 }
 0x158   :  { %v677_v12 = vmul.f32 %v647_v38, %v617_v33  ;;  %v679_v13 = vmul.f32 %v649_v27, %v619_v44  ;;  %v652_v1 = vsub.f32 0.0, %v382_v19  ;;  %v622_v15 = vsub.f32 %v1692_v32, %v1895_v7 }
 0x159   :  { %v678_v45 = vmul.f32 %v648_v41, %v618_v61  ;;  %v708_v36 = vsel %vm166_vm3, %v676_v11, 0.0  ;;  %v680_v35 = vmul.f32 %v650_v46, %v620_v57  ;;  %v385_v50 = vmul.f32 %v1846_v5, %v1565_v6 }
 0x15a   :  { %v709_v63 = vsel %vm166_vm3, %v677_v12, 0.0  ;;  %v653_v61 = vsub.f32 0.0, %v383_v62  ;;  %v623_v38 = vsub.f32 %v1701_v20, %v1901_v26  ;;  %v681_v41 = vmul.f32 %v651_v55, %v621_v59 }
 0x15b   :  { %v710_v33 = vsel %vm166_vm3, %v678_v45, 0.0  ;;  %v711_v25 = vsel %vm166_vm3, %v679_v13, 0.0  ;;  %v738_v32 = vsel %vm167_vm1, %v708_v36, 0.0  ;;  %v386_v44 = vmul.f32 %v1854_v56, %v1571_v16 }
 0x15c   :  { %v654_v27 = vsub.f32 0.0, %v384_v42  ;;  %v739_v39 = vsel %vm167_vm1, %v709_v63, 0.0  ;;  %v741_v19 = vsel %vm206_vm2, %v710_v33, 0.0  ;;  %v624_v6 = vsub.f32 %v1708_v3, %v1903_v17 }
 0x15d   :  { %v682_v11 = vmul.f32 %v652_v1, %v622_v15  ;;  %v712_v20 = vsel %vm166_vm3, %v680_v35, 0.0  ;;  %v740_v57 = vadd.f32 %v739_v39, %v738_v32  ;;  %v387_v46 = vmul.f32 %v1857_v43, %v1580_v37 }
 0x15e   :  { %v655_v12 = vsub.f32 0.0, %v385_v50  ;;  %v743_v45 = vsel %vm167_vm1, %v711_v25, 0.0  ;;  %v625_v16 = vsub.f32 %v1712_v60, %v1895_v7  ;;  %v683_v42 = vmul.f32 %v653_v61, %v623_v38 }
 0x15f   :  { %v713_v18 = vsel %vm166_vm3, %v681_v41, 0.0  ;;  %v742_v62 = vadd.f32 %v741_v19, %v740_v57  ;;  %v388_v3 = vmul.f32 %v1846_v5, %v1593_v54  ;;  %v656_v1 = vsub.f32 0.0, %v386_v44 }
 0x160   :  { %v745_v59 = vsel %vm167_vm1, %v712_v20, 0.0  ;;  %v626_v37 = vsub.f32 %v1719_v4, %v1901_v26  ;;  %v684_v55 = vmul.f32 %v654_v27, %v624_v6  ;;  %v714_v13 = vsel %vm166_vm3, %v682_v11, 0.0 }
 0x161   :  { %v744_v10 = vadd.f32 %v743_v45, %v742_v62  ;;  %v389_v60 = vmul.f32 %v1854_v56, %v1598_v23  ;;  %v657_v36 = vsub.f32 0.0, %v387_v46  ;;  %v747_v15 = vsel %vm206_vm2, %v713_v18, 0.0 }
 0x162   :  { %v627_v54 = vsub.f32 %v1752_v49, %v1903_v17  ;;  %v685_v35 = vmul.f32 %v655_v12, %v625_v16  ;;  %v715_v63 = vsel %vm166_vm3, %v683_v42, 0.0  ;;  %v390_v4 = vmul.f32 %v1857_v43, %v1607_v22 }
 0x163   :  { %v746_v33 = vadd.f32 %v745_v59, %v744_v10  ;;  %v658_v50 = vsub.f32 0.0, %v388_v3  ;;  %v749_v61 = vsel %vm167_vm1, %v714_v13, 0.0  ;;  %v628_v23 = vsub.f32 %v1756_v30, %v1895_v7 }
 0x164   :  { %v686_v38 = vmul.f32 %v656_v1, %v626_v37  ;;  %v716_v41 = vsel %vm166_vm3, %v684_v55, 0.0  ;;  %v391_v49 = vmul.f32 %v1846_v5, %v1616_v28  ;;  %v659_v32 = vsub.f32 0.0, %v389_v60  ;;  %v2209_v1 = vld [vmem:[#allocation11_spill] sm:$0xff] }
 0x165   :  { %v748_v25 = vadd.f32 %v747_v15, %v746_v33  ;;  %v751_v44 = vsel %vm167_vm1, %v715_v63, 0.0  ;;  %v629_v22 = vsub.f32 %v1760_v8, %v1901_v26  ;;  %v687_v27 = vmul.f32 %v657_v36, %v627_v54  ;;  %v2211_v36 = vld [vmem:[#allocation35_spill] sm:$0xff]  ;;  %v2212_v63 = vld [vmem:[#allocation28_spill] sm:$0xff] }
 0x166   :  { %v717_v39 = vsel %vm166_vm3, %v685_v35, 0.0  ;;  %v392_v30 = vmul.f32 %v1854_v56, %v1620_v58  ;;  %v660_v6 = vsub.f32 0.0, %v390_v4  ;;  %v753_v11 = vsel %vm206_vm2, %v716_v41, 0.0 }
 0x167   :  { %v750_v19 = vadd.f32 %v749_v61, %v748_v25  ;;  %v630_v28 = vsub.f32 %v1764_v34, %v1903_v17  ;;  %v688_v20 = vmul.f32 %v658_v50, %v628_v23  ;;  %v718_v57 = vsel %vm166_vm3, %v686_v38, 0.0  ;;  %v2213_v61 = vld [vmem:[#allocation36_spill] sm:$0xff] }
 0x168   :  { %v393_v8 = vmul.f32 %v1857_v43, %v1627_v29  ;;  %v661_v12 = vsub.f32 0.0, %v391_v49  ;;  %v755_v45 = vsel %vm167_vm1, %v717_v39, 0.0  ;;  %v631_v58 = vsub.f32 %v1768_v14, %v1895_v7  ;;  %v2210_v14 = vld [vmem:[#allocation27_spill] sm:$0xff]  ;;  %v2214_v49 = vld [vmem:[#allocation29_spill] sm:$0xff] }
 0x169   :  { %v752_v46 = vadd.f32 %v751_v44, %v750_v19  ;;  %v689_v16 = vmul.f32 %v659_v32, %v629_v22  ;;  %v719_v42 = vsel %vm166_vm3, %v687_v27, 0.0  ;;  %v394_v34 = vmul.f32 %v1846_v5, %v1637_v53  ;;  %v2215_v27 = vld [vmem:[#allocation13_spill] sm:$0xff] }
 0x16a   :  { %v662_v62 = vsub.f32 0.0, %v392_v30  ;;  %v757_v3 = vsel %vm167_vm1, %v718_v57, 0.0  ;;  %v632_v29 = vsub.f32 %v2209_v1, %v1901_v26  ;;  %v690_v59 = vmul.f32 %v660_v6, %v630_v28 }
 0x16b   :  { %v754_v18 = vadd.f32 %v753_v11, %v752_v46  ;;  %v720_v37 = vsel %vm166_vm3, %v688_v20, 0.0  ;;  %v395_v13 = vmul.f32 %v1854_v56, %v2210_v14  ;;  %v663_v10 = vsub.f32 0.0, %v393_v8  ;;  %v2216_v11 = vld [vmem:[#allocation30_spill] sm:$0xff] }
 0x16c   :  { %v759_v60 = vsel %vm206_vm2, %v719_v42, 0.0  ;;  %v633_v53 = vsub.f32 %v2211_v36, %v1903_v17  ;;  %v691_v15 = vmul.f32 %v661_v12, %v631_v58  ;;  %v721_v54 = vsel %vm166_vm3, %v689_v16, 0.0  ;;  %v2217_v58 = vld [vmem:[#allocation31_spill] sm:$0xff] }
 0x16d   :  { %v756_v55 = vadd.f32 %v755_v45, %v754_v18  ;;  %v396_v33 = vmul.f32 %v1857_v43, %v2212_v63  ;;  %v664_v4 = vsub.f32 0.0, %v394_v34  ;;  %v761_v50 = vsel %vm167_vm1, %v720_v37, 0.0 }
 0x16e   :  { %v634_v23 = vsub.f32 %v2213_v61, %v1895_v7  ;;  %v692_v38 = vmul.f32 %v662_v62, %v632_v29  ;;  %v722_v41 = vsel %vm166_vm3, %v690_v59, 0.0  ;;  %v397_v32 = vmul.f32 %v1846_v5, %v2214_v49  ;;  %v2219_v29 = vld [vmem:[#allocation10_spill] sm:$0xff] }
 0x16f   :  { %v758_v35 = vadd.f32 %v757_v3, %v756_v55  ;;  %v665_v44 = vsub.f32 0.0, %v395_v13  ;;  %v763_v22 = vsel %vm167_vm1, %v721_v54, 0.0  ;;  %v635_v39 = vsub.f32 %v2215_v27, %v1901_v26  ;;  %v2221_v55 = vld [vmem:[#allocation32_spill] sm:$0xff] }
 0x170   :  { %v693_v19 = vmul.f32 %v663_v10, %v633_v53  ;;  %v723_v30 = vsel %vm166_vm3, %v691_v15, 0.0  ;;  %v398_v28 = vmul.f32 %v1854_v56, %v2216_v11  ;;  %v666_v20 = vsub.f32 0.0, %v396_v33  ;;  %v2222_v15 = vld [vmem:[#allocation33_spill] sm:$0xff] }
 0x171   :  { %v760_v25 = vadd.f32 %v759_v60, %v758_v35  ;;  %v765_v57 = vsel %vm206_vm2, %v722_v41, 0.0  ;;  %v636_v46 = vsub.f32 %v1790_v48, %v1903_v17  ;;  %v694_v8 = vmul.f32 %v664_v4, %v634_v23  ;;  %v2218_v48 = vld [vmem:[#allocation9_spill] sm:$0xff] }
 0x172   :  { %v724_v12 = vsel %vm166_vm3, %v692_v38, 0.0  ;;  %v399_v16 = vmul.f32 %v1857_v43, %v2217_v58  ;;  %v667_v42 = vsub.f32 0.0, %v397_v32  ;;  %v767_v18 = vsel %vm167_vm1, %v723_v30, 0.0 }
 0x173   :  { %v762_v6 = vadd.f32 %v761_v50, %v760_v25  ;;  %v637_v34 = vsub.f32 %v1794_v2, %v1895_v7  ;;  %v695_v62 = vmul.f32 %v665_v44, %v635_v39  ;;  %v725_v3 = vsel %vm166_vm3, %v693_v19, 0.0 }
 0x174   :  { %v2220_v59 = vsub.f32 %v2218_v48, %v2219_v29  ;;  %v400_v14 = vmul.f32 %v1846_v5, %v2221_v55  ;;  %v668_v13 = vsub.f32 0.0, %v398_v28  ;;  %v769_v10 = vsel %vm167_vm1, %v724_v12, 0.0  ;;  %v53_v55 = vld [vmem:[#allocation3] sm:$0xff] }
 0x175   :  { %v764_v45 = vadd.f32 %v763_v22, %v762_v6  ;;  %v638_v60 = vsub.f32 %v1799_v47, %v1901_v26  ;;  %v696_v36 = vmul.f32 %v666_v20, %v636_v46  ;;  %v726_v2 = vsel %vm166_vm3, %v694_v8, 0.0  ;;  %v2223_v47 = vld [vmem:[#allocation34_spill] sm:$0xff] }
 0x176   :  { %v55_v37 = vmul.f32 1.442695, %v2220_v59  ;;  %v401_v54 = vmul.f32 %v1854_v56, %v2222_v15  ;;  %v669_v35 = vsub.f32 0.0, %v399_v16  ;;  %v771_v63 = vsel %vm206_vm2, %v725_v3, 0.0 }
 0x177   :  { %v766_v1 = vadd.f32 %v765_v57, %v764_v45  ;;  %v639_v5 = vsub.f32 %v1803_v40, %v1903_v17  ;;  %v697_v33 = vmul.f32 %v667_v42, %v637_v34  ;;  %v727_v4 = vsel %vm166_vm3, %v695_v62, 0.0  ;;  %v2224_v45 = vld [vmem:[#allocation23_spill] sm:$0xff] }
 0x178   :  { %967 = vpow2.f32 %v55_v37  ;;  %v402_v61 = vmul.f32 %v1857_v43, %v2223_v47  ;;  %v670_v23 = vsub.f32 0.0, %v400_v14  ;;  %v773_v38 = vsel %vm167_vm1, %v726_v2, 0.0 }
 0x179   :  { %v768_v53 = vadd.f32 %v767_v18, %v766_v1  ;;  %v640_v56 = vsub.f32 %v1808_v52, %v1895_v7  ;;  %v698_v41 = vmul.f32 %v668_v13, %v638_v60  ;;  %v728_v25 = vsel %vm166_vm3, %v696_v36, 0.0  ;;  %v2225_v18 = vld [vmem:[#allocation16_spill] sm:$0xff] }
 0x17a   :  { %v671_v49 = vsub.f32 0.0, %v401_v54  ;;  %v775_v32 = vsel %vm167_vm1, %v727_v4, 0.0  ;;  %v641_v44 = vsub.f32 %v1812_v51, %v1901_v26  ;;  %v699_v22 = vmul.f32 %v669_v35, %v639_v5 }
 0x17b   :  { %v770_v50 = vadd.f32 %v769_v10, %v768_v53  ;;  %v729_v43 = vsel %vm166_vm3, %v697_v33, 0.0  ;;  %v672_v39 = vsub.f32 0.0, %v402_v61  ;;  %v777_v19 = vsel %vm206_vm2, %v728_v25, 0.0  ;;  %v78_v33 = vld [vmem:[#allocation5] sm:$0xff] }
 0x17c   :  { %v642_v52 = vsub.f32 %v1817_v21, %v1903_v17  ;;  %v700_v30 = vmul.f32 %v670_v23, %v640_v56  ;;  %v730_v6 = vsel %vm166_vm3, %v698_v41, 0.0  ;;  %v673_v28 = vsub.f32 0.0, %v1868_v31  ;;  %v72_v56 = vld [vmem:[#allocation4] sm:$0xff] }
 0x17d   :  { %v772_v40 = vadd.f32 %v771_v63, %v770_v50  ;;  %v779_v51 = vsel %vm167_vm1, %v729_v43, 0.0  ;;  %v643_v20 = vsub.f32 %v1833_v24, %v1895_v7  ;;  %v701_v57 = vmul.f32 %v671_v49, %v641_v44  ;;  %v2226_v7 = vld [vmem:[#allocation12_spill] sm:$0xff] }
 0x17e   :  { %v731_v46 = vsel %vm166_vm3, %v699_v22, 0.0  ;;  %v674_v12 = vsub.f32 0.0, %v1874_v9  ;;  %v781_v21 = vsel %vm167_vm1, %v730_v6, 0.0  ;;  %v644_v58 = vsub.f32 %v2224_v45, %v1901_v26  ;;  %v86_v44 = vld [vmem:[#allocation2] sm:$0xff] }
 0x17f   :  { %v774_v27 = vadd.f32 %v773_v38, %v772_v40  ;;  %v702_v16 = vmul.f32 %v672_v39, %v642_v52  ;;  %v732_v31 = vsel %vm166_vm3, %v700_v30, 0.0  ;;  %v675_v34 = vsub.f32 0.0, %v2225_v18 }
 0x180   :  { %v783_v24 = vsel %vm206_vm2, %v731_v46, 0.0  ;;  %v645_v62 = vsub.f32 %v2226_v7, %v1903_v17  ;;  %v703_v3 = vmul.f32 %v673_v28, %v643_v20  ;;  %v733_v9 = vsel %vm166_vm3, %v701_v57, 0.0 }
 0x181   :  { %v776_v11 = vadd.f32 %v775_v32, %v774_v27  ;;  %v785_v48 = vsel %vm167_vm1, %v732_v31, 0.0  ;;  %v704_v29 = vmul.f32 %v674_v12, %v644_v58  ;;  %v734_v59 = vsel %vm166_vm3, %v702_v16, 0.0 }
 0x182   :  { %v787_v14 = vsel %vm167_vm1, %v733_v9, 0.0  ;;  %v705_v13 = vmul.f32 %v675_v34, %v645_v62  ;;  %v735_v17 = vsel %vm166_vm3, %v703_v3, 0.0  ;;  %v789_v60 = vsel %vm206_vm2, %v734_v59, 0.0 }
 0x183   :  { %v778_v8 = vadd.f32 %v777_v19, %v776_v11  ;;  %v736_v2 = vsel %vm166_vm3, %v704_v29, 0.0  ;;  %v791_v54 = vsel %vm167_vm1, %v735_v17, 0.0 }
 0x184   :  { %v737_v63 = vsel %vm166_vm3, %v705_v13, 0.0  ;;  %v793_v4 = vsel %vm167_vm1, %v736_v2, 0.0 }
 0x185   :  { %v780_v42 = vadd.f32 %v779_v51, %v778_v8  ;;  %v968_v26 = vpop.eup %967  ;;  %v795_v61 = vsel %vm206_vm2, %v737_v63, 0.0 }
 0x186   :  { %v57_v36 = vmul.f32 %v968_v26, %v53_v55 }
 0x187   :  { %v782_v1 = vadd.f32 %v781_v21, %v780_v42 }
 0x189   :  { %v784_v37 = vadd.f32 %v783_v24, %v782_v1 }
 0x18b   :  { %v786_v10 = vadd.f32 %v785_v48, %v784_v37 }
 0x18d   :  { %v788_v53 = vadd.f32 %v787_v14, %v786_v10 }
 0x18f   :  { %v790_v5 = vadd.f32 %v789_v60, %v788_v53 }
 0x191   :  { %v792_v50 = vadd.f32 %v791_v54, %v790_v5 }
 0x193   :  { %v794_v38 = vadd.f32 %v793_v4, %v792_v50 }
 0x195   :  { %v796_v41 = vadd.f32 %v795_v61, %v794_v38 }
 0x1a5   :  { %v67_v15 = vpop.xlane.xlu1 %66 }
 0x1a6   :  { %v68_v35 = vadd.f32 %v67_v15, %v57_v36 }
 0x1a8   :  { %70 = vst.msk [vmem:[#allocation3] sm:$0xff] %vm22_vm0, %v68_v35 }
 0x1a9   :  { %v80_v47 = vpop.xlane.xlu1 %79 }
 0x1aa   :  { %v81_v23 = vadd.f32 %v80_v47, %v78_v33 }
 0x1ac   :  { %82 = vst.msk [vmem:[#allocation5] sm:$0xff] %vm22_vm0, %v81_v23 }
 0x1ad   :  { %v75_v25 = vpop.xlane.xlu1 %74 }
 0x1ae   :  { %v76_v40 = vadd.f32 %v75_v25, %v72_v56 }
 0x1af   :  { %v87_v0 = vld [vmem:[#allocation3] sm:$0xff] }
 0x1b0   :  { %77 = vst.msk [vmem:[#allocation4] sm:$0xff] %vm22_vm0, %v76_v40  ;;  %969 = vlog2.f32 %v87_v0 }
 0x1b3   :  { %v91_v43 = vld [vmem:[#allocation5] sm:$0xff] }
 0x1b7   :  { %v93_v27 = vld [vmem:[#allocation4] sm:$0xff] }
 0x1bd   :  { %v970_v49 = vpop.eup %969 }
 0x1be   :  { %v89_v32 = vmul.f32 0.6931472, %v970_v49 }
 0x1c0   :  { %v90_v22 = vadd.f32 %v89_v32, %v86_v44 }
 0x1c2   :  { %v92_v39 = vmul.f32 %v91_v43, %v90_v22 }
 0x1c4   :  { %v94_v19 = vsub.f32 %v92_v39, %v93_v27 }
 0x1c6   :  { %v95_v52 = vsel %vm22_vm0, %v94_v19, 0.0 }
 0x1c7   :  { %96 = vadd.xlane.f32.xlu1 %v95_v52 }
 0x1cb   :  { %797 = vadd.xlane.f32.xlu1 %v796_v41 }
 0x250   :  { %v97_v30 = vpop.xlane.xlu1 %96 }
 0x251   :  { %v98_v6 = vrot.slane %v97_v30, 4 }
 0x253   :  { %v99_v11 = vadd.f32 %v98_v6, %v97_v30 }
 0x254   :  { %v798_v28 = vpop.xlane.xlu1 %797 }
 0x255   :  { %v100_v51 = vrot.slane %v99_v11, 2  ;;  %v799_v20 = vrot.slane %v798_v28, 4 }
 0x257   :  { %v800_v57 = vadd.f32 %v799_v20, %v798_v28  ;;  %v101_v46 = vadd.f32 %v100_v51, %v99_v11 }
 0x259   :  { %v801_v8 = vrot.slane %v800_v57, 2  ;;  %v102_v12 = vrot.slane %v101_v46, 1 }
 0x25b   :  { %v802_v21 = vadd.f32 %v801_v8, %v800_v57  ;;  %v103_v45 = vadd.f32 %v102_v12, %v101_v46 }
 0x25d   :  { %824 = vpush %v103_v45  ;;  %v803_v58 = vrot.slane %v802_v21, 1 }
 0x25f   :  { %v804_v16 = vadd.f32 %v803_v58, %v802_v21 }
 0x261   :  { %826 = vpush %v804_v16 }
 0x28e   :  { %s825_s1 = spop %824 }
 0x292   :  { %s827_s27 = spop %826 }
 0x293   :  { %s806_s28 = smul.f32 0.5, %s827_s27 }
 0x295   :  { %s807_s5 = sadd.f32 %s825_s1, %s806_s28 }
 0x297   :  { %v808_v31 = vstv %s807_s5 }
 0x298   :  { %809 = vst [vmem:[#allocation6] sm:$0xff] %v808_v31 }
 0x299   :  { %982 = shalt.err (!%p979_p4)
}
 0x29a   :  { %819 = dma.vmem_to_hbm [thread:$0]  %s817_s30, 128, %s2123_s4, [#allocation7]  }
 0x29b   :  { %991 = dma.done.wait [#allocation7], 128  }
 0x29c   :  { %992 = vsyncadd [#allocation7], 4294967168 }
 0x29d   :  { %823 = vsyncpa [#allocation7], 1 }

</bundles_post_ra>
